<compile_context>
chip_gen: v5e
topology: v5e:2x2
jax: 0.10.0
libtpu: 0.0.40
codegen_flags: <defaults>
</compile_context>

<pallas_src>
import numpy as np
import jax
import jax.numpy as jnp
from jax import lax
from jax.experimental import pallas as pl
from jax.experimental.pallas import tpu as pltpu

EPS = 1e-5
LEAKY_SLOPE = 0.01


def _round_up(x, m):
    return ((x + m - 1) // m) * m


def _pick_row_tile(rp, two_m):
    """Lane-dense column tile (multiple of 128).

    Must be >= two_m so [tile | next tile] always covers every shifted tap
    window.  Prefer the largest candidate that keeps >= 2 tiles (v7x 2-TC load
    balance) and <= ~25% padding waste; never fall back to an unbounded full-R
    tile.
    """
    lo = max(256, _round_up(two_m, 128))
    best = None
    for tr in (4096, 2048, 1024, 512, 256):
        if tr < lo or pl.cdiv(rp, tr) < 2:
            continue
        if best is None:
            best = tr
        if pl.cdiv(rp, tr) * tr <= rp + rp // 4:
            return tr
    if best is not None:
        return best
    return _round_up(max(rp, lo), 128)   # tiny volume: a single tile covers it


def res_core_element(x_ncdhw, w1, b1, w2, b2, gamma, beta):
    """x: (N, Cin, D, H, W); w1: (Cout, Cin, 3,3,3); w2: (Cout, Cin, 1,1,1)."""
    del b1, b2  # cancelled exactly by training-mode BatchNorm (see _reference)

    N, Cin, D, H, W = x_ncdhw.shape
    Cout = w1.shape[0]
    Dp, Hp, Wp = D + 2, H + 2, W + 2
    s_d, s_h = Hp * Wp, Wp                    # flat strides in the padded volume
    margin = s_d + s_h + 1                    # max |tap offset| in flat coords
    Rp = Dp * Hp * Wp                         # padded-volume positions per batch
    R = N * D * H * W                         # true BN element count per channel
    Cpad = _round_up(Cin, 8)                  # sublane-align the contract dim

    TR = _pick_row_tile(Rp, 2 * margin)
    n_tiles = pl.cdiv(Rp, TR)
    L = n_tiles * TR                          # padded output columns per batch
    Ltot = (n_tiles + 1) * TR                 # +1 tile: right-halo source

    # ---- activation prep (single cheap pass, bf16): pad volume + channels,
    # flatten, and add flat margins so every tap read stays in-bounds.
    xp = jnp.pad(x_ncdhw, ((0, 0), (0, Cpad - Cin), (1, 1), (1, 1), (1, 1)))
    x_flat = xp.reshape(N, Cpad, Rp)
    x_lin = jnp.pad(x_flat, ((0, 0), (0, 0), (margin, Ltot - margin - Rp)))
    x_lin = x_lin.astype(jnp.bfloat16)

    # ---- weights: fold the 1x1x1 conv into the 3x3x3 center tap (same math).
    w_fold = w1.at[:, :, 1, 1, 1].add(w2[:, :, 0, 0, 0])
    w_fold = jnp.pad(w_fold, ((0, 0), (0, Cpad - Cin), (0, 0), (0, 0), (0, 0)))
    wt = jnp.transpose(w_fold, (2, 3, 4, 0, 1)).reshape(27, Cout, Cpad)
    wt = wt.astype(jnp.bfloat16)

    # Static per-tap offsets into the in-kernel (Cpad, 2*TR) window.
    tap_off = tuple(kd * s_d + kh * s_h + kw
                    for kd in range(3) for kh in range(3) for kw in range(3))

    # ---- validity mask: 1.0 on interior (non-pad) columns of the padded volume.
    q = np.arange(L)
    dq, rem = q // s_d, q % s_d
    hq, wq = rem // Wp, rem % Wp
    valid = ((q < Rp) & (dq >= 1) & (dq <= D) & (hq >= 1) & (hq <= H)
             & (wq >= 1) & (wq <= W))
    mask = jnp.asarray(valid.astype(np.float32)).reshape(1, L)
    counts = jnp.asarray(valid.reshape(n_tiles, TR).sum(axis=1).astype(np.float32))

    cparams = pltpu.CompilerParams(
        dimension_semantics=("parallel", "parallel"),
        vmem_limit_bytes=32 * 1024 * 1024)    # tiles are tiny; safe on v5e/v6e/v7x

    # ---------------- pass A: conv-sum + per-tile robust BN partials ---------
    def conv_stats_kernel(w_ref, xa_ref, xb_ref, m_ref, s_ref, sum_ref, m2_ref):
        xa = xa_ref[0]                                   # (Cpad, TR) bf16
        xb = xb_ref[0]                                   # right-halo tile
        xw = jnp.concatenate([xa, xb], axis=1)           # (Cpad, 2*TR)
        w = w_ref[...]                                   # (27, Cout, Cpad) bf16
        acc = jnp.zeros((Cout, TR), jnp.float32)
        for t, off in enumerate(tap_off):                # 27 shifted-window matmuls
            acc = acc + jnp.dot(w[t], xw[:, off:off + TR],
                                preferred_element_type=jnp.float32)
        m = m_ref[...]                                   # (1, TR) validity mask
        s = acc * m                                      # zero padded/garbage cols
        s_ref[...] = s[None].astype(s_ref.dtype)         # bf16 intermediate
        # Per-tile partials from the f32 accumulator: sum and mean-centred M2
        # (combined with Chan's formula in the wrapper -> no cancellation).
        cnt = jnp.sum(m, axis=1, keepdims=True)          # (1, 1)
        ssum = jnp.sum(s, axis=1, keepdims=True)         # (Cout, 1)
        mu = ssum / jnp.maximum(cnt, 1.0)
        m2 = jnp.sum(((acc - mu) ** 2) * m, axis=1, keepdims=True)
        sum_ref[...] = ssum[None]
        m2_ref[...] = m2[None]

    s_pad, tsum, tm2 = pl.pallas_call(
        conv_stats_kernel,
        out_shape=(jax.ShapeDtypeStruct((N, Cout, L), jnp.bfloat16),
                   jax.ShapeDtypeStruct((N * n_tiles, Cout, 1), jnp.float32),
                   jax.ShapeDtypeStruct((N * n_tiles, Cout, 1), jnp.float32)),
        grid=(N, n_tiles),
        in_specs=[pl.BlockSpec((27, Cout, Cpad), lambda n, i: (0, 0, 0)),
                  pl.BlockSpec((1, Cpad, TR), lambda n, i: (n, 0, i)),
                  pl.BlockSpec((1, Cpad, TR), lambda n, i: (n, 0, i + 1)),
                  pl.BlockSpec((1, TR), lambda n, i: (0, i))],
        out_specs=(pl.BlockSpec((1, Cout, TR), lambda n, i: (n, 0, i)),
                   pl.BlockSpec((1, Cout, 1), lambda n, i: (n * n_tiles + i, 0, 0)),
                   pl.BlockSpec((1, Cout, 1), lambda n, i: (n * n_tiles + i, 0, 0))),
        compiler_params=cparams,
    )(wt, x_lin, x_lin, mask)

    # ---- combine partials (Chan) + fold gamma/beta into scale/shift (f32) ---
    ssum = tsum[:, :, 0]                                 # (N*n_tiles, Cout)
    m2 = tm2[:, :, 0]
    cnt = jnp.tile(counts, N)[:, None]                   # matches n*n_tiles+i order
    mean = jnp.sum(ssum, axis=0) / R                     # (Cout,)
    mu_t = ssum / jnp.maximum(cnt, 1.0)
    m2_tot = jnp.sum(m2, axis=0) + jnp.sum(cnt * (mu_t - mean[None, :]) ** 2, axis=0)
    var = m2_tot / R                                     # biased (BN training mode)
    inv_std = 1.0 / jnp.sqrt(var + EPS)
    scale_c = gamma.astype(jnp.float32) * inv_std
    shift_c = beta.astype(jnp.float32) - mean * scale_c
    scale = scale_c.reshape(Cout, 1)
    shift = shift_c.reshape(Cout, 1)

    # ---------------- pass B: normalize + leaky ReLU (lane-dense tiles) ------
    def bn_lrelu_kernel(s_ref, scale_ref, shift_ref, o_ref):
        s = s_ref[...].astype(jnp.float32)               # (1, Cout, TR)
        y = s * scale_ref[...] + shift_ref[...]
        o_ref[...] = jnp.where(y > 0, y, LEAKY_SLOPE * y)

    y_pad = pl.pallas_call(
        bn_lrelu_kernel,
        out_shape=jax.ShapeDtypeStruct((N, Cout, L), jnp.float32),
        grid=(N, n_tiles),
        in_specs=[pl.BlockSpec((1, Cout, TR), lambda n, i: (n, 0, i)),
                  pl.BlockSpec((Cout, 1), lambda n, i: (0, 0)),
                  pl.BlockSpec((Cout, 1), lambda n, i: (0, 0))],
        out_specs=pl.BlockSpec((1, Cout, TR), lambda n, i: (n, 0, i)),
        compiler_params=cparams,
    )(s_pad, scale, shift)

    # Strip the flat padding and slice the interior of the padded volume:
    # result is already NCDHW, no trailing transpose.
    y = y_pad[:, :, :Rp].reshape(N, Cout, Dp, Hp, Wp)
    return y[:, :, 1:1 + D, 1:1 + H, 1:1 + W]


def _reference(x, w1, b1, w2, b2, gamma, beta):
    """Independent pure-JAX f32 reference (NCDHW, PyTorch semantics, with biases)."""
    dn1 = lax.conv_dimension_numbers(x.shape, w1.shape, ("NCDHW", "OIDHW", "NCDHW"))
    dn2 = lax.conv_dimension_numbers(x.shape, w2.shape, ("NCDHW", "OIDHW", "NCDHW"))
    x1 = lax.conv_general_dilated(x, w1, (1, 1, 1), "SAME", dimension_numbers=dn1)
    x1 = x1 + b1[None, :, None, None, None]
    x2 = lax.conv_general_dilated(x, w2, (1, 1, 1), "SAME", dimension_numbers=dn2)
    x2 = x2 + b2[None, :, None, None, None]
    s = x1 + x2
    mean = jnp.mean(s, axis=(0, 2, 3, 4), keepdims=True)
    var = jnp.mean((s - mean) ** 2, axis=(0, 2, 3, 4), keepdims=True)
    xn = (s - mean) / jnp.sqrt(var + EPS)
    y = xn * gamma[None, :, None, None, None] + beta[None, :, None, None, None]
    return jnp.where(y > 0, y, LEAKY_SLOPE * y)


if __name__ == "__main__":
    key = jax.random.PRNGKey(0)
    k_x, k_w1, k_b1, k_w2, k_b2, k_g, k_bt = jax.random.split(key, 7)

    N, Cin, Cout = 2, 4, 8
    D = H = W = 8

    x = jax.random.normal(k_x, (N, Cin, D, H, W), dtype=jnp.float32)
    w1 = 0.1 * jax.random.normal(k_w1, (Cout, Cin, 3, 3, 3), dtype=jnp.float32)
    b1 = 0.1 * jax.random.normal(k_b1, (Cout,), dtype=jnp.float32)
    w2 = 0.1 * jax.random.normal(k_w2, (Cout, Cin, 1, 1, 1), dtype=jnp.float32)
    b2 = 0.1 * jax.random.normal(k_b2, (Cout,), dtype=jnp.float32)
    gamma = 1.0 + 0.1 * jax.random.normal(k_g, (Cout,), dtype=jnp.float32)
    beta = 0.1 * jax.random.normal(k_bt, (Cout,), dtype=jnp.float32)

    out = jax.block_until_ready(res_core_element(x, w1, b1, w2, b2, gamma, beta))
    ref = jax.block_until_ready(_reference(x, w1, b1, w2, b2, gamma, beta))

    # bf16 MXU operands (f32 accumulation across 27 taps) give ~1e-2 absolute
    # error on the unit-variance normalized output; 2e-2 bounds it while still
    # catching any structural / indexing mistake.
    np.testing.assert_allclose(np.asarray(out), np.asarray(ref),
                               rtol=2e-2, atol=2e-2)
    print("KERNEL_OK")
</pallas_src>

<mosaic_0001>
module attributes {stable_mosaic.version = 11 : i64} {
  func.func @conv_stats_kernel(%arg0: i32, %arg1: i32, %arg2: memref<27x8x8xbf16, #tpu.memory_space<vmem>>, %arg3: memref<1x8x512xbf16, #tpu.memory_space<vmem>>, %arg4: memref<1x8x512xbf16, #tpu.memory_space<vmem>>, %arg5: memref<1x512xf32, #tpu.memory_space<vmem>>, %arg6: memref<1x8x512xbf16, #tpu.memory_space<vmem>>, %arg7: memref<1x8x1xf32, #tpu.memory_space<vmem>>, %arg8: memref<1x8x1xf32, #tpu.memory_space<vmem>>) attributes {dimension_semantics = [#tpu.dimension_semantics<parallel>, #tpu.dimension_semantics<parallel>], iteration_bounds = array<i64: 2, 2>, scalar_prefetch = 0 : i64, scratch_operands = 0 : i64, tpu.core_type = #tpu.core_type<tc>, window_params = [{pipeline_mode = #tpu.pipeline_mode<synchronous>, transform_indices = @transform_0, window_bounds = array<i64: 27, 8, 8>}, {transform_indices = @transform_1, window_bounds = array<i64: 1, 8, 512>}, {transform_indices = @transform_2, window_bounds = array<i64: 1, 8, 512>}, {transform_indices = @transform_3, window_bounds = array<i64: 1, 512>}, {transform_indices = @transform_4, window_bounds = array<i64: 1, 8, 512>}, {transform_indices = @transform_5, window_bounds = array<i64: 1, 8, 1>}, {transform_indices = @transform_6, window_bounds = array<i64: 1, 8, 1>}]} {
    %c0 = arith.constant 0 : index
    %c0_0 = arith.constant 0 : index
    %c0_1 = arith.constant 0 : index
    %0 = vector.load %arg3[%c0, %c0_0, %c0_1] : memref<1x8x512xbf16, #tpu.memory_space<vmem>>, vector<1x8x512xbf16>
    %1 = vector.shape_cast %0 : vector<1x8x512xbf16> to vector<8x512xbf16>
    %c0_2 = arith.constant 0 : index
    %c0_3 = arith.constant 0 : index
    %c0_4 = arith.constant 0 : index
    %2 = vector.load %arg4[%c0_2, %c0_3, %c0_4] : memref<1x8x512xbf16, #tpu.memory_space<vmem>>, vector<1x8x512xbf16>
    %3 = vector.shape_cast %2 : vector<1x8x512xbf16> to vector<8x512xbf16>
    %4 = tpu.concatenate %1, %3 in 1 : vector<8x512xbf16>, vector<8x512xbf16> -> vector<8x1024xbf16>
    %c0_5 = arith.constant 0 : index
    %c0_6 = arith.constant 0 : index
    %c0_7 = arith.constant 0 : index
    %5 = vector.load %arg2[%c0_5, %c0_6, %c0_7] : memref<27x8x8xbf16, #tpu.memory_space<vmem>>, vector<27x8x8xbf16>
    %cst = arith.constant 0.000000e+00 : f32
    %6 = vector.broadcast %cst : f32 to vector<8x512xf32>
    %7 = vector.extract_strided_slice %5 {offsets = [0, 0, 0], sizes = [1, 8, 8], strides = [1, 1, 1]} : vector<27x8x8xbf16> to vector<1x8x8xbf16>
    %8 = vector.shape_cast %7 : vector<1x8x8xbf16> to vector<8x8xbf16>
    %9 = vector.extract_strided_slice %4 {offsets = [0, 0], sizes = [8, 512], strides = [1, 1]} : vector<8x1024xbf16> to vector<8x512xbf16>
    %cst_8 = arith.constant dense<0.000000e+00> : vector<8x512xf32>
    %10 = tpu.matmul %8, %9, %cst_8 {dimension_numbers = #tpu.dot_dimension_numbers<[1], [0], [0], [1], [0, 0, 1, 1], [], []>} : vector<8x8xbf16>, vector<8x512xbf16>, vector<8x512xf32> -> vector<8x512xf32>
    %11 = arith.addf %6, %10 : vector<8x512xf32>
    %12 = vector.extract_strided_slice %5 {offsets = [1, 0, 0], sizes = [1, 8, 8], strides = [1, 1, 1]} : vector<27x8x8xbf16> to vector<1x8x8xbf16>
    %13 = vector.shape_cast %12 : vector<1x8x8xbf16> to vector<8x8xbf16>
    %14 = vector.extract_strided_slice %4 {offsets = [0, 1], sizes = [8, 512], strides = [1, 1]} : vector<8x1024xbf16> to vector<8x512xbf16>
    %cst_9 = arith.constant dense<0.000000e+00> : vector<8x512xf32>
    %15 = tpu.matmul %13, %14, %cst_9 {dimension_numbers = #tpu.dot_dimension_numbers<[1], [0], [0], [1], [0, 0, 1, 1], [], []>} : vector<8x8xbf16>, vector<8x512xbf16>, vector<8x512xf32> -> vector<8x512xf32>
    %16 = arith.addf %11, %15 : vector<8x512xf32>
    %17 = vector.extract_strided_slice %5 {offsets = [2, 0, 0], sizes = [1, 8, 8], strides = [1, 1, 1]} : vector<27x8x8xbf16> to vector<1x8x8xbf16>
    %18 = vector.shape_cast %17 : vector<1x8x8xbf16> to vector<8x8xbf16>
    %19 = vector.extract_strided_slice %4 {offsets = [0, 2], sizes = [8, 512], strides = [1, 1]} : vector<8x1024xbf16> to vector<8x512xbf16>
    %cst_10 = arith.constant dense<0.000000e+00> : vector<8x512xf32>
    %20 = tpu.matmul %18, %19, %cst_10 {dimension_numbers = #tpu.dot_dimension_numbers<[1], [0], [0], [1], [0, 0, 1, 1], [], []>} : vector<8x8xbf16>, vector<8x512xbf16>, vector<8x512xf32> -> vector<8x512xf32>
    %21 = arith.addf %16, %20 : vector<8x512xf32>
    %22 = vector.extract_strided_slice %5 {offsets = [3, 0, 0], sizes = [1, 8, 8], strides = [1, 1, 1]} : vector<27x8x8xbf16> to vector<1x8x8xbf16>
    %23 = vector.shape_cast %22 : vector<1x8x8xbf16> to vector<8x8xbf16>
    %24 = vector.extract_strided_slice %4 {offsets = [0, 10], sizes = [8, 512], strides = [1, 1]} : vector<8x1024xbf16> to vector<8x512xbf16>
    %cst_11 = arith.constant dense<0.000000e+00> : vector<8x512xf32>
    %25 = tpu.matmul %23, %24, %cst_11 {dimension_numbers = #tpu.dot_dimension_numbers<[1], [0], [0], [1], [0, 0, 1, 1], [], []>} : vector<8x8xbf16>, vector<8x512xbf16>, vector<8x512xf32> -> vector<8x512xf32>
    %26 = arith.addf %21, %25 : vector<8x512xf32>
    %27 = vector.extract_strided_slice %5 {offsets = [4, 0, 0], sizes = [1, 8, 8], strides = [1, 1, 1]} : vector<27x8x8xbf16> to vector<1x8x8xbf16>
    %28 = vector.shape_cast %27 : vector<1x8x8xbf16> to vector<8x8xbf16>
    %29 = vector.extract_strided_slice %4 {offsets = [0, 11], sizes = [8, 512], strides = [1, 1]} : vector<8x1024xbf16> to vector<8x512xbf16>
    %cst_12 = arith.constant dense<0.000000e+00> : vector<8x512xf32>
    %30 = tpu.matmul %28, %29, %cst_12 {dimension_numbers = #tpu.dot_dimension_numbers<[1], [0], [0], [1], [0, 0, 1, 1], [], []>} : vector<8x8xbf16>, vector<8x512xbf16>, vector<8x512xf32> -> vector<8x512xf32>
    %31 = arith.addf %26, %30 : vector<8x512xf32>
    %32 = vector.extract_strided_slice %5 {offsets = [5, 0, 0], sizes = [1, 8, 8], strides = [1, 1, 1]} : vector<27x8x8xbf16> to vector<1x8x8xbf16>
    %33 = vector.shape_cast %32 : vector<1x8x8xbf16> to vector<8x8xbf16>
    %34 = vector.extract_strided_slice %4 {offsets = [0, 12], sizes = [8, 512], strides = [1, 1]} : vector<8x1024xbf16> to vector<8x512xbf16>
    %cst_13 = arith.constant dense<0.000000e+00> : vector<8x512xf32>
    %35 = tpu.matmul %33, %34, %cst_13 {dimension_numbers = #tpu.dot_dimension_numbers<[1], [0], [0], [1], [0, 0, 1, 1], [], []>} : vector<8x8xbf16>, vector<8x512xbf16>, vector<8x512xf32> -> vector<8x512xf32>
    %36 = arith.addf %31, %35 : vector<8x512xf32>
    %37 = vector.extract_strided_slice %5 {offsets = [6, 0, 0], sizes = [1, 8, 8], strides = [1, 1, 1]} : vector<27x8x8xbf16> to vector<1x8x8xbf16>
    %38 = vector.shape_cast %37 : vector<1x8x8xbf16> to vector<8x8xbf16>
    %39 = vector.extract_strided_slice %4 {offsets = [0, 20], sizes = [8, 512], strides = [1, 1]} : vector<8x1024xbf16> to vector<8x512xbf16>
    %cst_14 = arith.constant dense<0.000000e+00> : vector<8x512xf32>
    %40 = tpu.matmul %38, %39, %cst_14 {dimension_numbers = #tpu.dot_dimension_numbers<[1], [0], [0], [1], [0, 0, 1, 1], [], []>} : vector<8x8xbf16>, vector<8x512xbf16>, vector<8x512xf32> -> vector<8x512xf32>
    %41 = arith.addf %36, %40 : vector<8x512xf32>
    %42 = vector.extract_strided_slice %5 {offsets = [7, 0, 0], sizes = [1, 8, 8], strides = [1, 1, 1]} : vector<27x8x8xbf16> to vector<1x8x8xbf16>
    %43 = vector.shape_cast %42 : vector<1x8x8xbf16> to vector<8x8xbf16>
    %44 = vector.extract_strided_slice %4 {offsets = [0, 21], sizes = [8, 512], strides = [1, 1]} : vector<8x1024xbf16> to vector<8x512xbf16>
    %cst_15 = arith.constant dense<0.000000e+00> : vector<8x512xf32>
    %45 = tpu.matmul %43, %44, %cst_15 {dimension_numbers = #tpu.dot_dimension_numbers<[1], [0], [0], [1], [0, 0, 1, 1], [], []>} : vector<8x8xbf16>, vector<8x512xbf16>, vector<8x512xf32> -> vector<8x512xf32>
    %46 = arith.addf %41, %45 : vector<8x512xf32>
    %47 = vector.extract_strided_slice %5 {offsets = [8, 0, 0], sizes = [1, 8, 8], strides = [1, 1, 1]} : vector<27x8x8xbf16> to vector<1x8x8xbf16>
    %48 = vector.shape_cast %47 : vector<1x8x8xbf16> to vector<8x8xbf16>
    %49 = vector.extract_strided_slice %4 {offsets = [0, 22], sizes = [8, 512], strides = [1, 1]} : vector<8x1024xbf16> to vector<8x512xbf16>
    %cst_16 = arith.constant dense<0.000000e+00> : vector<8x512xf32>
    %50 = tpu.matmul %48, %49, %cst_16 {dimension_numbers = #tpu.dot_dimension_numbers<[1], [0], [0], [1], [0, 0, 1, 1], [], []>} : vector<8x8xbf16>, vector<8x512xbf16>, vector<8x512xf32> -> vector<8x512xf32>
    %51 = arith.addf %46, %50 : vector<8x512xf32>
    %52 = vector.extract_strided_slice %5 {offsets = [9, 0, 0], sizes = [1, 8, 8], strides = [1, 1, 1]} : vector<27x8x8xbf16> to vector<1x8x8xbf16>
    %53 = vector.shape_cast %52 : vector<1x8x8xbf16> to vector<8x8xbf16>
    %54 = vector.extract_strided_slice %4 {offsets = [0, 100], sizes = [8, 512], strides = [1, 1]} : vector<8x1024xbf16> to vector<8x512xbf16>
    %cst_17 = arith.constant dense<0.000000e+00> : vector<8x512xf32>
    %55 = tpu.matmul %53, %54, %cst_17 {dimension_numbers = #tpu.dot_dimension_numbers<[1], [0], [0], [1], [0, 0, 1, 1], [], []>} : vector<8x8xbf16>, vector<8x512xbf16>, vector<8x512xf32> -> vector<8x512xf32>
    %56 = arith.addf %51, %55 : vector<8x512xf32>
    %57 = vector.extract_strided_slice %5 {offsets = [10, 0, 0], sizes = [1, 8, 8], strides = [1, 1, 1]} : vector<27x8x8xbf16> to vector<1x8x8xbf16>
    %58 = vector.shape_cast %57 : vector<1x8x8xbf16> to vector<8x8xbf16>
    %59 = vector.extract_strided_slice %4 {offsets = [0, 101], sizes = [8, 512], strides = [1, 1]} : vector<8x1024xbf16> to vector<8x512xbf16>
    %cst_18 = arith.constant dense<0.000000e+00> : vector<8x512xf32>
    %60 = tpu.matmul %58, %59, %cst_18 {dimension_numbers = #tpu.dot_dimension_numbers<[1], [0], [0], [1], [0, 0, 1, 1], [], []>} : vector<8x8xbf16>, vector<8x512xbf16>, vector<8x512xf32> -> vector<8x512xf32>
    %61 = arith.addf %56, %60 : vector<8x512xf32>
    %62 = vector.extract_strided_slice %5 {offsets = [11, 0, 0], sizes = [1, 8, 8], strides = [1, 1, 1]} : vector<27x8x8xbf16> to vector<1x8x8xbf16>
    %63 = vector.shape_cast %62 : vector<1x8x8xbf16> to vector<8x8xbf16>
    %64 = vector.extract_strided_slice %4 {offsets = [0, 102], sizes = [8, 512], strides = [1, 1]} : vector<8x1024xbf16> to vector<8x512xbf16>
    %cst_19 = arith.constant dense<0.000000e+00> : vector<8x512xf32>
    %65 = tpu.matmul %63, %64, %cst_19 {dimension_numbers = #tpu.dot_dimension_numbers<[1], [0], [0], [1], [0, 0, 1, 1], [], []>} : vector<8x8xbf16>, vector<8x512xbf16>, vector<8x512xf32> -> vector<8x512xf32>
    %66 = arith.addf %61, %65 : vector<8x512xf32>
    %67 = vector.extract_strided_slice %5 {offsets = [12, 0, 0], sizes = [1, 8, 8], strides = [1, 1, 1]} : vector<27x8x8xbf16> to vector<1x8x8xbf16>
    %68 = vector.shape_cast %67 : vector<1x8x8xbf16> to vector<8x8xbf16>
    %69 = vector.extract_strided_slice %4 {offsets = [0, 110], sizes = [8, 512], strides = [1, 1]} : vector<8x1024xbf16> to vector<8x512xbf16>
    %cst_20 = arith.constant dense<0.000000e+00> : vector<8x512xf32>
    %70 = tpu.matmul %68, %69, %cst_20 {dimension_numbers = #tpu.dot_dimension_numbers<[1], [0], [0], [1], [0, 0, 1, 1], [], []>} : vector<8x8xbf16>, vector<8x512xbf16>, vector<8x512xf32> -> vector<8x512xf32>
    %71 = arith.addf %66, %70 : vector<8x512xf32>
    %72 = vector.extract_strided_slice %5 {offsets = [13, 0, 0], sizes = [1, 8, 8], strides = [1, 1, 1]} : vector<27x8x8xbf16> to vector<1x8x8xbf16>
    %73 = vector.shape_cast %72 : vector<1x8x8xbf16> to vector<8x8xbf16>
    %74 = vector.extract_strided_slice %4 {offsets = [0, 111], sizes = [8, 512], strides = [1, 1]} : vector<8x1024xbf16> to vector<8x512xbf16>
    %cst_21 = arith.constant dense<0.000000e+00> : vector<8x512xf32>
    %75 = tpu.matmul %73, %74, %cst_21 {dimension_numbers = #tpu.dot_dimension_numbers<[1], [0], [0], [1], [0, 0, 1, 1], [], []>} : vector<8x8xbf16>, vector<8x512xbf16>, vector<8x512xf32> -> vector<8x512xf32>
    %76 = arith.addf %71, %75 : vector<8x512xf32>
    %77 = vector.extract_strided_slice %5 {offsets = [14, 0, 0], sizes = [1, 8, 8], strides = [1, 1, 1]} : vector<27x8x8xbf16> to vector<1x8x8xbf16>
    %78 = vector.shape_cast %77 : vector<1x8x8xbf16> to vector<8x8xbf16>
    %79 = vector.extract_strided_slice %4 {offsets = [0, 112], sizes = [8, 512], strides = [1, 1]} : vector<8x1024xbf16> to vector<8x512xbf16>
    %cst_22 = arith.constant dense<0.000000e+00> : vector<8x512xf32>
    %80 = tpu.matmul %78, %79, %cst_22 {dimension_numbers = #tpu.dot_dimension_numbers<[1], [0], [0], [1], [0, 0, 1, 1], [], []>} : vector<8x8xbf16>, vector<8x512xbf16>, vector<8x512xf32> -> vector<8x512xf32>
    %81 = arith.addf %76, %80 : vector<8x512xf32>
    %82 = vector.extract_strided_slice %5 {offsets = [15, 0, 0], sizes = [1, 8, 8], strides = [1, 1, 1]} : vector<27x8x8xbf16> to vector<1x8x8xbf16>
    %83 = vector.shape_cast %82 : vector<1x8x8xbf16> to vector<8x8xbf16>
    %84 = vector.extract_strided_slice %4 {offsets = [0, 120], sizes = [8, 512], strides = [1, 1]} : vector<8x1024xbf16> to vector<8x512xbf16>
    %cst_23 = arith.constant dense<0.000000e+00> : vector<8x512xf32>
    %85 = tpu.matmul %83, %84, %cst_23 {dimension_numbers = #tpu.dot_dimension_numbers<[1], [0], [0], [1], [0, 0, 1, 1], [], []>} : vector<8x8xbf16>, vector<8x512xbf16>, vector<8x512xf32> -> vector<8x512xf32>
    %86 = arith.addf %81, %85 : vector<8x512xf32>
    %87 = vector.extract_strided_slice %5 {offsets = [16, 0, 0], sizes = [1, 8, 8], strides = [1, 1, 1]} : vector<27x8x8xbf16> to vector<1x8x8xbf16>
    %88 = vector.shape_cast %87 : vector<1x8x8xbf16> to vector<8x8xbf16>
    %89 = vector.extract_strided_slice %4 {offsets = [0, 121], sizes = [8, 512], strides = [1, 1]} : vector<8x1024xbf16> to vector<8x512xbf16>
    %cst_24 = arith.constant dense<0.000000e+00> : vector<8x512xf32>
    %90 = tpu.matmul %88, %89, %cst_24 {dimension_numbers = #tpu.dot_dimension_numbers<[1], [0], [0], [1], [0, 0, 1, 1], [], []>} : vector<8x8xbf16>, vector<8x512xbf16>, vector<8x512xf32> -> vector<8x512xf32>
    %91 = arith.addf %86, %90 : vector<8x512xf32>
    %92 = vector.extract_strided_slice %5 {offsets = [17, 0, 0], sizes = [1, 8, 8], strides = [1, 1, 1]} : vector<27x8x8xbf16> to vector<1x8x8xbf16>
    %93 = vector.shape_cast %92 : vector<1x8x8xbf16> to vector<8x8xbf16>
    %94 = vector.extract_strided_slice %4 {offsets = [0, 122], sizes = [8, 512], strides = [1, 1]} : vector<8x1024xbf16> to vector<8x512xbf16>
    %cst_25 = arith.constant dense<0.000000e+00> : vector<8x512xf32>
    %95 = tpu.matmul %93, %94, %cst_25 {dimension_numbers = #tpu.dot_dimension_numbers<[1], [0], [0], [1], [0, 0, 1, 1], [], []>} : vector<8x8xbf16>, vector<8x512xbf16>, vector<8x512xf32> -> vector<8x512xf32>
    %96 = arith.addf %91, %95 : vector<8x512xf32>
    %97 = vector.extract_strided_slice %5 {offsets = [18, 0, 0], sizes = [1, 8, 8], strides = [1, 1, 1]} : vector<27x8x8xbf16> to vector<1x8x8xbf16>
    %98 = vector.shape_cast %97 : vector<1x8x8xbf16> to vector<8x8xbf16>
    %99 = vector.extract_strided_slice %4 {offsets = [0, 200], sizes = [8, 512], strides = [1, 1]} : vector<8x1024xbf16> to vector<8x512xbf16>
    %cst_26 = arith.constant dense<0.000000e+00> : vector<8x512xf32>
    %100 = tpu.matmul %98, %99, %cst_26 {dimension_numbers = #tpu.dot_dimension_numbers<[1], [0], [0], [1], [0, 0, 1, 1], [], []>} : vector<8x8xbf16>, vector<8x512xbf16>, vector<8x512xf32> -> vector<8x512xf32>
    %101 = arith.addf %96, %100 : vector<8x512xf32>
    %102 = vector.extract_strided_slice %5 {offsets = [19, 0, 0], sizes = [1, 8, 8], strides = [1, 1, 1]} : vector<27x8x8xbf16> to vector<1x8x8xbf16>
    %103 = vector.shape_cast %102 : vector<1x8x8xbf16> to vector<8x8xbf16>
    %104 = vector.extract_strided_slice %4 {offsets = [0, 201], sizes = [8, 512], strides = [1, 1]} : vector<8x1024xbf16> to vector<8x512xbf16>
    %cst_27 = arith.constant dense<0.000000e+00> : vector<8x512xf32>
    %105 = tpu.matmul %103, %104, %cst_27 {dimension_numbers = #tpu.dot_dimension_numbers<[1], [0], [0], [1], [0, 0, 1, 1], [], []>} : vector<8x8xbf16>, vector<8x512xbf16>, vector<8x512xf32> -> vector<8x512xf32>
    %106 = arith.addf %101, %105 : vector<8x512xf32>
    %107 = vector.extract_strided_slice %5 {offsets = [20, 0, 0], sizes = [1, 8, 8], strides = [1, 1, 1]} : vector<27x8x8xbf16> to vector<1x8x8xbf16>
    %108 = vector.shape_cast %107 : vector<1x8x8xbf16> to vector<8x8xbf16>
    %109 = vector.extract_strided_slice %4 {offsets = [0, 202], sizes = [8, 512], strides = [1, 1]} : vector<8x1024xbf16> to vector<8x512xbf16>
    %cst_28 = arith.constant dense<0.000000e+00> : vector<8x512xf32>
    %110 = tpu.matmul %108, %109, %cst_28 {dimension_numbers = #tpu.dot_dimension_numbers<[1], [0], [0], [1], [0, 0, 1, 1], [], []>} : vector<8x8xbf16>, vector<8x512xbf16>, vector<8x512xf32> -> vector<8x512xf32>
    %111 = arith.addf %106, %110 : vector<8x512xf32>
    %112 = vector.extract_strided_slice %5 {offsets = [21, 0, 0], sizes = [1, 8, 8], strides = [1, 1, 1]} : vector<27x8x8xbf16> to vector<1x8x8xbf16>
    %113 = vector.shape_cast %112 : vector<1x8x8xbf16> to vector<8x8xbf16>
    %114 = vector.extract_strided_slice %4 {offsets = [0, 210], sizes = [8, 512], strides = [1, 1]} : vector<8x1024xbf16> to vector<8x512xbf16>
    %cst_29 = arith.constant dense<0.000000e+00> : vector<8x512xf32>
    %115 = tpu.matmul %113, %114, %cst_29 {dimension_numbers = #tpu.dot_dimension_numbers<[1], [0], [0], [1], [0, 0, 1, 1], [], []>} : vector<8x8xbf16>, vector<8x512xbf16>, vector<8x512xf32> -> vector<8x512xf32>
    %116 = arith.addf %111, %115 : vector<8x512xf32>
    %117 = vector.extract_strided_slice %5 {offsets = [22, 0, 0], sizes = [1, 8, 8], strides = [1, 1, 1]} : vector<27x8x8xbf16> to vector<1x8x8xbf16>
    %118 = vector.shape_cast %117 : vector<1x8x8xbf16> to vector<8x8xbf16>
    %119 = vector.extract_strided_slice %4 {offsets = [0, 211], sizes = [8, 512], strides = [1, 1]} : vector<8x1024xbf16> to vector<8x512xbf16>
    %cst_30 = arith.constant dense<0.000000e+00> : vector<8x512xf32>
    %120 = tpu.matmul %118, %119, %cst_30 {dimension_numbers = #tpu.dot_dimension_numbers<[1], [0], [0], [1], [0, 0, 1, 1], [], []>} : vector<8x8xbf16>, vector<8x512xbf16>, vector<8x512xf32> -> vector<8x512xf32>
    %121 = arith.addf %116, %120 : vector<8x512xf32>
    %122 = vector.extract_strided_slice %5 {offsets = [23, 0, 0], sizes = [1, 8, 8], strides = [1, 1, 1]} : vector<27x8x8xbf16> to vector<1x8x8xbf16>
    %123 = vector.shape_cast %122 : vector<1x8x8xbf16> to vector<8x8xbf16>
    %124 = vector.extract_strided_slice %4 {offsets = [0, 212], sizes = [8, 512], strides = [1, 1]} : vector<8x1024xbf16> to vector<8x512xbf16>
    %cst_31 = arith.constant dense<0.000000e+00> : vector<8x512xf32>
    %125 = tpu.matmul %123, %124, %cst_31 {dimension_numbers = #tpu.dot_dimension_numbers<[1], [0], [0], [1], [0, 0, 1, 1], [], []>} : vector<8x8xbf16>, vector<8x512xbf16>, vector<8x512xf32> -> vector<8x512xf32>
    %126 = arith.addf %121, %125 : vector<8x512xf32>
    %127 = vector.extract_strided_slice %5 {offsets = [24, 0, 0], sizes = [1, 8, 8], strides = [1, 1, 1]} : vector<27x8x8xbf16> to vector<1x8x8xbf16>
    %128 = vector.shape_cast %127 : vector<1x8x8xbf16> to vector<8x8xbf16>
    %129 = vector.extract_strided_slice %4 {offsets = [0, 220], sizes = [8, 512], strides = [1, 1]} : vector<8x1024xbf16> to vector<8x512xbf16>
    %cst_32 = arith.constant dense<0.000000e+00> : vector<8x512xf32>
    %130 = tpu.matmul %128, %129, %cst_32 {dimension_numbers = #tpu.dot_dimension_numbers<[1], [0], [0], [1], [0, 0, 1, 1], [], []>} : vector<8x8xbf16>, vector<8x512xbf16>, vector<8x512xf32> -> vector<8x512xf32>
    %131 = arith.addf %126, %130 : vector<8x512xf32>
    %132 = vector.extract_strided_slice %5 {offsets = [25, 0, 0], sizes = [1, 8, 8], strides = [1, 1, 1]} : vector<27x8x8xbf16> to vector<1x8x8xbf16>
    %133 = vector.shape_cast %132 : vector<1x8x8xbf16> to vector<8x8xbf16>
    %134 = vector.extract_strided_slice %4 {offsets = [0, 221], sizes = [8, 512], strides = [1, 1]} : vector<8x1024xbf16> to vector<8x512xbf16>
    %cst_33 = arith.constant dense<0.000000e+00> : vector<8x512xf32>
    %135 = tpu.matmul %133, %134, %cst_33 {dimension_numbers = #tpu.dot_dimension_numbers<[1], [0], [0], [1], [0, 0, 1, 1], [], []>} : vector<8x8xbf16>, vector<8x512xbf16>, vector<8x512xf32> -> vector<8x512xf32>
    %136 = arith.addf %131, %135 : vector<8x512xf32>
    %137 = vector.extract_strided_slice %5 {offsets = [26, 0, 0], sizes = [1, 8, 8], strides = [1, 1, 1]} : vector<27x8x8xbf16> to vector<1x8x8xbf16>
    %138 = vector.shape_cast %137 : vector<1x8x8xbf16> to vector<8x8xbf16>
    %139 = vector.extract_strided_slice %4 {offsets = [0, 222], sizes = [8, 512], strides = [1, 1]} : vector<8x1024xbf16> to vector<8x512xbf16>
    %cst_34 = arith.constant dense<0.000000e+00> : vector<8x512xf32>
    %140 = tpu.matmul %138, %139, %cst_34 {dimension_numbers = #tpu.dot_dimension_numbers<[1], [0], [0], [1], [0, 0, 1, 1], [], []>} : vector<8x8xbf16>, vector<8x512xbf16>, vector<8x512xf32> -> vector<8x512xf32>
    %141 = arith.addf %136, %140 : vector<8x512xf32>
    %c0_35 = arith.constant 0 : index
    %c0_36 = arith.constant 0 : index
    %142 = vector.load %arg5[%c0_35, %c0_36] : memref<1x512xf32, #tpu.memory_space<vmem>>, vector<1x512xf32>
    %143 = vector.broadcast %142 : vector<1x512xf32> to vector<8x512xf32>
    %144 = arith.mulf %141, %143 : vector<8x512xf32>
    %145 = vector.shape_cast %144 : vector<8x512xf32> to vector<1x8x512xf32>
    %146 = arith.truncf %145 : vector<1x8x512xf32> to vector<1x8x512xbf16>
    %c0_37 = arith.constant 0 : index
    %c0_38 = arith.constant 0 : index
    %c0_39 = arith.constant 0 : index
    %147 = vector.load %arg6[%c0_37, %c0_38, %c0_39] : memref<1x8x512xbf16, #tpu.memory_space<vmem>>, vector<1x8x512xbf16>
    tpu.vector_store %arg6[%c0_37, %c0_38, %c0_39], %146 {strides = array<i32>} : memref<1x8x512xbf16, #tpu.memory_space<vmem>>, vector<1x8x512xbf16>,
    %cst_40 = arith.constant dense<0.000000e+00> : vector<1xf32>
    %148 = vector.multi_reduction <add>, %142, %cst_40 [1] : vector<1x512xf32> to vector<1xf32>
    %149 = vector.shape_cast %148 : vector<1xf32> to vector<1x1xf32>
    %cst_41 = arith.constant dense<0.000000e+00> : vector<8xf32>
    %150 = vector.multi_reduction <add>, %144, %cst_41 [1] : vector<8x512xf32> to vector<8xf32>
    %151 = vector.shape_cast %150 : vector<8xf32> to vector<8x1xf32>
    %cst_42 = arith.constant 1.000000e+00 : f32
    %152 = vector.broadcast %cst_42 : f32 to vector<1x1xf32>
    %153 = arith.maximumf %149, %152 : vector<1x1xf32>
    %154 = vector.broadcast %153 : vector<1x1xf32> to vector<8x1xf32>
    %155 = arith.divf %151, %154 : vector<8x1xf32>
    %156 = vector.broadcast %155 : vector<8x1xf32> to vector<8x512xf32>
    %157 = arith.subf %141, %156 : vector<8x512xf32>
    %158 = arith.mulf %157, %157 : vector<8x512xf32>
    %159 = vector.broadcast %142 : vector<1x512xf32> to vector<8x512xf32>
    %160 = arith.mulf %158, %159 : vector<8x512xf32>
    %cst_43 = arith.constant dense<0.000000e+00> : vector<8xf32>
    %161 = vector.multi_reduction <add>, %160, %cst_43 [1] : vector<8x512xf32> to vector<8xf32>
    %162 = vector.shape_cast %161 : vector<8xf32> to vector<8x1xf32>
    %163 = vector.shape_cast %151 : vector<8x1xf32> to vector<1x8x1xf32>
    %c0_44 = arith.constant 0 : index
    %c0_45 = arith.constant 0 : index
    %c0_46 = arith.constant 0 : index
    %164 = vector.load %arg7[%c0_44, %c0_45, %c0_46] : memref<1x8x1xf32, #tpu.memory_space<vmem>>, vector<1x8x1xf32>
    tpu.vector_store %arg7[%c0_44, %c0_45, %c0_46], %163 {strides = array<i32>} : memref<1x8x1xf32, #tpu.memory_space<vmem>>, vector<1x8x1xf32>,
    %165 = vector.shape_cast %162 : vector<8x1xf32> to vector<1x8x1xf32>
    %c0_47 = arith.constant 0 : index
    %c0_48 = arith.constant 0 : index
    %c0_49 = arith.constant 0 : index
    %166 = vector.load %arg8[%c0_47, %c0_48, %c0_49] : memref<1x8x1xf32, #tpu.memory_space<vmem>>, vector<1x8x1xf32>
    tpu.vector_store %arg8[%c0_47, %c0_48, %c0_49], %165 {strides = array<i32>} : memref<1x8x1xf32, #tpu.memory_space<vmem>>, vector<1x8x1xf32>,
    return
  }
  func.func @transform_0(%arg0: i32, %arg1: i32) -> (i32, i32, i32) {
    %c0_i32 = arith.constant 0 : i32
    %c0_i32_0 = arith.constant 0 : i32
    %c0_i32_1 = arith.constant 0 : i32
    %c0_i32_2 = arith.constant 0 : i32
    return %c0_i32, %c0_i32_0, %c0_i32_1 : i32, i32, i32
  }
  func.func @transform_1(%arg0: i32, %arg1: i32) -> (i32, i32, i32) {
    %c0_i32 = arith.constant 0 : i32
    %c0_i32_0 = arith.constant 0 : i32
    return %arg0, %c0_i32, %arg1 : i32, i32, i32
  }
  func.func @transform_2(%arg0: i32, %arg1: i32) -> (i32, i32, i32) {
    %c1_i32 = arith.constant 1 : i32
    %0 = arith.addi %arg1, %c1_i32 : i32
    %c0_i32 = arith.constant 0 : i32
    %c0_i32_0 = arith.constant 0 : i32
    return %arg0, %c0_i32, %0 : i32, i32, i32
  }
  func.func @transform_3(%arg0: i32, %arg1: i32) -> (i32, i32) {
    %c0_i32 = arith.constant 0 : i32
    %c0_i32_0 = arith.constant 0 : i32
    return %c0_i32, %arg1 : i32, i32
  }
  func.func @transform_4(%arg0: i32, %arg1: i32) -> (i32, i32, i32) {
    %c0_i32 = arith.constant 0 : i32
    %c0_i32_0 = arith.constant 0 : i32
    return %arg0, %c0_i32, %arg1 : i32, i32, i32
  }
  func.func @transform_5(%arg0: i32, %arg1: i32) -> (i32, i32, i32) {
    %c2_i32 = arith.constant 2 : i32
    %0 = arith.muli %arg0, %c2_i32 : i32
    %1 = arith.addi %0, %arg1 : i32
    %c0_i32 = arith.constant 0 : i32
    %c0_i32_0 = arith.constant 0 : i32
    %c0_i32_1 = arith.constant 0 : i32
    return %1, %c0_i32, %c0_i32_0 : i32, i32, i32
  }
  func.func @transform_6(%arg0: i32, %arg1: i32) -> (i32, i32, i32) {
    %c2_i32 = arith.constant 2 : i32
    %0 = arith.muli %arg0, %c2_i32 : i32
    %1 = arith.addi %0, %arg1 : i32
    %c0_i32 = arith.constant 0 : i32
    %c0_i32_0 = arith.constant 0 : i32
    %c0_i32_1 = arith.constant 0 : i32
    return %1, %c0_i32, %c0_i32_0 : i32, i32, i32
  }
}

</mosaic_0001>

<bundles_post_ra>
// kernel: tpu_custom_call.1
= control target key start
LH: loop header
LB: loop body
LE: loop exit
PB: predicated region body
PF: predicated region fallthrough
CT: control target
= control target key end

     0   :  { %s4371_s0 = inlined_call_operand.vmem [shape: bf16[27,8,8], index: 0, kind: input, shape index: {}]   ;;  %s4372_s1 = inlined_call_operand.vmem [shape: bf16[2,8,1536], index: 1, kind: input, shape index: {}]   ;;  %s4373_s2 = inlined_call_operand.hbm [shape: bf16[2,8,1536], index: 2, kind: input, shape index: {}]   ;;  %s4374_s3 = inlined_call_operand.vmem [shape: f32[1,1024], index: 3, kind: input, shape index: {}]   ;;  %s4375_s4 = inlined_call_operand.hbm [shape: bf16[2,8,1024], index: 4, kind: output, shape index: {0}]   ;;  %s4376_s5 = inlined_call_operand.vmem [shape: f32[4,8,1], index: 5, kind: output, shape index: {1}]   ;;  %s4377_s6 = inlined_call_operand.vmem [shape: f32[4,8,1], index: 6, kind: output, shape index: {2}]  }
   0x1   :  { %4383 = sst [smem:[#allocation15_spill]] %s4377_s6 }
   0x2   :  { %12 = vsyncpa [#allocation3], 0 }
   0x3   :  { %14 = vsyncpa [#allocation3 + $0x1], 0 }
   0x4   :  { %15 = vsyncpa [#allocation4], 0 }
   0x5   :  { %17 = vsyncpa [#allocation4 + $0x1], 0  ;;  %s3496_s21 = smov 0   ;;  %s3498_s22 = smov 0  }
   0x6   :  { %s3500_s23 = smov 0   ;;  %s3502_s24 = smov 0  }
   0x7   :  { %s3504_s25 = smov 0   ;;  %s3506_s26 = smov 0  }
   0x8   :  { %s3508_s27 = smov 0   ;;  %s3510_s28 = smov 0  }
   0x9   :  { %s3512_s29 = smov 0   ;;  %s3514_s30 = smov 0  }
   0xa   :  { %s3516_s7 = smov 0  }
   0xb LB: > { %4384 = sst [smem:[#allocation8_spill]] %s3401_s23  ;;  %s3015_s8 = sadd.s32 4294967295, %s3433_s7   ;;  %s3433_s7 = sphi %s3516_s7, %s23_s7   ;;  %s3429_s30 = sphi %s3514_s30, %s4411_s30   ;;  %s3425_s29 = sphi %s3512_s29, %s4410_s29   ;;  %s3421_s28 = sphi %s3510_s28, %s4409_s28   ;;  %s3417_s27 = sphi %s3508_s27, %s4408_s27   ;;  %s3413_s26 = sphi %s3506_s26, %s4401_s26   ;;  %s3409_s25 = sphi %s3504_s25, %s4407_s25   ;;  %s3405_s24 = sphi %s3502_s24, %s4406_s24   ;;  %s3401_s23 = sphi %s3500_s23, %s4399_s23   ;;  %s3397_s22 = sphi %s3498_s22, %s4405_s22   ;;  %s3393_s21 = sphi %s3496_s21, %s4404_s21  }
   0xc   : > { %4385 = sst [smem:[#allocation9_spill]] %s3413_s26  ;;  %s32_s10 = sadd.s32 1, %s3425_s29 }
   0xd   : > { %s35_s11 = sadd.s32 1, %s3429_s30  ;;  %p33_p0 = scmp.ge.s32.totalorder %s32_s10, 2 }
   0xe   : > { %s95_s12 = sadd.s32 1, %s3413_s26  ;;  %p102_p1 = scmp.ne.s32.totalorder %s3413_s26, %s3409_s25 }
   0xf   : > { %p103_p2 = scmp.eq.s32.totalorder %s3433_s7, 0  ;;  %s4413_s11 = smov (!%p33_p0, %s35_s11), %s3429_s30 }
  0x10   : > { %s3557_s13 = scalar_select %p33_p0, 0, %s32_s10  }
  0x11   : > { %p3561_p3 = por %p103_p2, %p102_p1  ;;  %p37_p4 = scmp.ge.s32.totalorder %s4413_s11, 2 }
  0x12   : > { %4386 = sst [smem:[#allocation10_spill]] %s3557_s13  ;;  %s89_s14 = sadd.s32 1, %s3557_s13 }
  0x13   : > { %s91_s16 = ssub.s32 %s32_s10, %s89_s14  ;;  %p108_p5 = scmp.ne.s32.totalorder %s3409_s25, %s3405_s24 }
  0x14   : > { %p109_p6 = scmp.eq.s32.totalorder %s3015_s8, 0  ;;  %s4415_s11 = smov (%p37_p4, %s4413_s11), 0 }
  0x15   : > { %4388 = sst [smem:[#allocation11_spill]] %s4415_s11  ;;  %s145_s18 = ssub.s32 %s3425_s29, %s3557_s13 }
  0x16   : > { %p3568_p7 = por %p109_p6, %p108_p5  ;;  %s90_s19 = ssub.s32 %s3429_s30, %s4415_s11 }
  0x17   : > { %s149_s20 = sadd.s32 1, %s3401_s23  ;;  %s92_s9 = sor.u32 %s91_s16, %s90_s19 }
  0x18   : > { %s146_s24 = sor.u32 %s145_s18, %s90_s19  ;;  %p93_p8 = scmp.eq.s32.totalorder %s92_s9, 0 }
  0x19   : > { %p147_p9 = scmp.eq.s32.totalorder %s146_s24, 0  ;;  %p159_p10 = scmp.ne.s32.totalorder %s3401_s23, %s3397_s22 }
  0x1a   : > { %p160_p11 = scmp.eq.s32.totalorder %s3015_s8, 3  ;;  %p165_p13 = scmp.ne.s32.totalorder %s3397_s22, %s3393_s21 }
  0x1b   : > { %s3580_s10 = scalar_select %p93_p8, %s3413_s26, %s95_s12  }
  0x1c   : > { %s3583_s14 = scalar_select %p147_p9, %s3401_s23, %s149_s20  }
  0x1d   : > { %4390 = sst [smem:[#allocation12_spill]] %s3580_s10  ;;  %p3585_p12 = por %p160_p11, %p159_p10 }
  0x1e   : > { %4391 = sst [smem:[#allocation13_spill]] %s3583_s14  ;;  %s4393_s11 = sadd.s32 4294967294, %s3433_s7  }
  0x1f   : > { %p166_p0 = scmp.eq.s32.totalorder %s4393_s11, 3  ;;  %p3163_p1 = scmp.lt.s32.totalorder %s3433_s7, 4 }
  0x20   : > { %s262_s16 = sand.u32 1, %s3413_s26   ;;  %s3024_s12 = sshll.u32 %s3425_s29, 2 }
  0x21   : > { %p3595_p2 = por %p166_p0, %p165_p13  ;;  %s3023_s8 = sshll.u32 %s262_s16, 4 }
  0x22   : > { %s2898_s18 = smul.u32 12, %s3429_s30  ;;  %s266_s19 = scalar_lea.vmem [#allocation2], %s3023_s8 }
  0x23   : > { %s4394_s9 = scalar_select %p3595_p2, 1, 0 }
  0x24   : > { %s278_s20 = sshll.u32 %s266_s19, 4  ;;  %p3156_p4 = pnand %p3163_p1, %p3561_p3  ;;  %s279_s20 = int_to_ptr.vmem [resolvable:$true] %s278_s20 }
  0x25   : > { %4395 = sst [smem:[#allocation14_spill]] %s4394_s9  ;;  %s2899_s24 = sadd.s32 %s3024_s12, %s2898_s18 }
  0x26   : > { %s3025_s13 = sshll.u32 %s2899_s24, 2  ;;  %p3026_p5 = scmp.ge.s32.totalorder %s3433_s7, 1 }
  0x27   : > { %s2901_s11 = scalar_lea.hbm %s4373_s2, %s3025_s13  ;;  %p291_p6 = scmp.lt.s32.totalorder %s3433_s7, 5 }
  0x28   : > { %s2902_s26 = scalar_lea.hbm %s2901_s11, 16  ;;  %s263_s9 = scalar_lea.sflag [#allocation3], %s262_s16 }
  0x29   : > { %s276_s23 = sshll.u32 %s2902_s26, 4  ;;  %p292_p8 = pnand %p3026_p5, %p291_p6  ;;  %s277_s23 = int_to_ptr.hbm [resolvable:$true] %s276_s23 }
  0x2a   : > { %3158 = dma.hbm_to_vmem [thread:$0]  (!%p3156_p4), %s277_s23, 256, %s279_s20, %s263_s9  }
  0x2b   : > { %295 = sbr.rel (%p292_p8) target bundleno = 994 (0x3e2), region = 36  ;;  %s297_s15 = sand.u32 (!%p292_p8), 1, %s3409_s25  }
  0x2c   : > { %s3027_s8 = sshll.u32 (!%p292_p8), %s297_s15, 4  ;;  %s298_s12 = scalar_lea.sflag (!%p292_p8), [#allocation3], %s297_s15 }
  0x2d   : > { %s301_s18 = scalar_lea.vmem (!%p292_p8), [#allocation2], %s3027_s8 }
  0x30   : > { %3384 = dma.done.wait (%p3568_p7), %s298_s12, 256  }
  0x31   : > { %3386 = vsyncadd (%p3568_p7), %s298_s12, 4294967040  ;;  %s3614_s26 = sshll.u32 %s3417_s27, 2  ;;  %p357_p3 = scmp.lt.s32.totalorder %s3421_s28, 1  ;;  %v3620_v0 = vld [vmem:[%s301_s18] sm:$0xff]  ;;  %vm446_vm0 = vcmask 1039360   ;;  %vm455_vm1 = vcmask 1043456  }
  0x32   : > { %p359_p9 = scmp.lt.s32.totalorder %s3614_s26, 11  ;;  %v405_v1 = vunpack.c.l.b16 %v3620_v0  ;;  %s3435_s20 = smov 127   ;;  %v410_v21 = vld [vmem:[%s4371_s0 + $0x4] sm:$0xf]  ;;  %vm451_vm2 = vcmask 64512   ;;  %vm597_vm3 = vcmask 1031168  }
  0x33   : > { %s358_s23 = scalar_select %p357_p3, %s3421_s28, 1  ;;  %v409_v41 = vld [vmem:[%s4371_s0] sm:$0xf]  ;;  %vm683_vm4 = vcmask 965632   ;;  %v411_v60 = vld [vmem:[%s4371_s0 + $0x8] sm:$0xf] }
  0x34   : > { %s360_s13 = scalar_select %p359_p9, %s3614_s26, 11  ;;  %v3626_v2 = vpack.c.b16 %v405_v1, %v405_v1  ;;  %vm769_vm5 = vcmask 957440   ;;  %vm855_vm6 = vcmask 949248   ;;  %vm941_vm7 = vcmask 883712  }
  0x35   : > { %s3150_s10 = smul.u32 12, %s358_s23  ;;  %s3436_s24 = smov 126   ;;  %vm1027_vm8 = vcmask 875520   ;;  %vm1113_vm9 = vcmask 867328   ;;  %vm1199_vm10 = vcmask 228352   ;;  %vm1285_vm11 = vcmask 220160  }
  0x36   : > { %444 = vrot.lane.b32.xlu1 %v3626_v2, %s3435_s20  ;;  %s3437_s11 = smov 118   ;;  %s3438_s15 = smov 117   ;;  %vm1371_vm12 = vcmask 211968   ;;  %vm1457_vm13 = vcmask 146432   ;;  %vm1543_vm14 = vcmask 138240   ;;  %vm1629_vm15 = vcmask 130048  }
  0x37   : > { %s362_s14 = sadd.s32 %s3150_s10, %s360_s13  ;;  %s3439_s8 = smov 116  }
  0x38   : > { %s3030_s16 = sshll.u32 %s362_s14, 2  ;;  %s3440_s12 = smov 108  }
  0x39   : > { %s364_s19 = scalar_lea.vmem %s4372_s1, %s3030_s16  ;;  %s3441_s18 = smov 107  }
  0x3a   : > { %v392_v3 = vld [vmem:[%s364_s19 + $0x8] sm:$0xff]  ;;  %v391_v4 = vld [vmem:[%s364_s19] sm:$0xff]  ;;  %s3442_s23 = smov 106   ;;  %s3443_s13 = smov 28  }
  0x3b   : > { %v398_v5 = vunpack.c.l.b16 %v392_v3  ;;  %v397_v6 = vunpack.c.h.b16 %v391_v4  ;;  %v396_v7 = vunpack.c.l.b16 %v391_v4  ;;  %v399_v10 = vunpack.c.h.b16 %v392_v3  ;;  %s3444_s16 = smov 27   ;;  %s3445_s17 = smov 26  }
  0x3c   : > { %s3449_s10 = smov 8   ;;  %s3451_s9 = smov 6  }
  0x3d   : > { %v3629_v8 = vpack.c.b16 %v398_v5, %v398_v5  ;;  %v3631_v9 = vpack.c.b16 %v397_v6, %v397_v6  ;;  %v3635_v11 = vpack.c.b16 %v396_v7, %v396_v7  ;;  %v3637_v12 = vpack.c.b16 %v399_v10, %v399_v10  ;;  %s3455_s14 = smov 46   ;;  %p369_p7 = scmp.lt.s32.totalorder %s3614_s26, 7 }
  0x3f   : > { %440 = vrot.lane.b32.xlu0 %v3629_v8, %s3435_s20  ;;  %438 = vrot.lane.b32.xlu2 %v3631_v9, %s3435_s20  ;;  %v527_v19 = vsel %vm455_vm1, %v3631_v9, 0  ;;  %v524_v25 = vsel %vm455_vm1, %v3635_v11, 0  ;;  %v530_v30 = vsel %vm455_vm1, %v3629_v8, 0  ;;  %v533_v33 = vsel %vm455_vm1, %v3637_v12, 0 }
  0x40   : > { %436 = vrot.lane.b32.xlu1 %v3635_v11, %s3435_s20 }
  0x47   : > { %442 = vrot.lane.b32.xlu0 %v3637_v12, %s3435_s20  ;;  %591 = vrot.lane.b32.xlu2 %v3629_v8, %s3436_s24  ;;  %s3446_s20 = smov 18  }
  0x48   : > { %595 = vrot.lane.b32.xlu1 %v3626_v2, %s3436_s24 }
  0x4f   : > { %593 = vrot.lane.b32.xlu0 %v3637_v12, %s3436_s24  ;;  %587 = vrot.lane.b32.xlu2 %v3635_v11, %s3436_s24 }
  0x50   : > { %677 = vrot.lane.b32.xlu1 %v3629_v8, %s3437_s11 }
  0x57   : > { %589 = vrot.lane.b32.xlu0 %v3631_v9, %s3436_s24  ;;  %679 = vrot.lane.b32.xlu2 %v3637_v12, %s3437_s11  ;;  %s3452_s24 = smov 56  }
  0x58   : > { %673 = vrot.lane.b32.xlu1 %v3635_v11, %s3437_s11 }
  0x5f   : > { %681 = vrot.lane.b32.xlu0 %v3626_v2, %s3437_s11  ;;  %675 = vrot.lane.b32.xlu2 %v3631_v9, %s3437_s11  ;;  %s3458_s11 = smov 36  }
  0x60   : > { %765 = vrot.lane.b32.xlu1 %v3637_v12, %s3438_s15 }
  0x67   : > { %763 = vrot.lane.b32.xlu0 %v3629_v8, %s3438_s15  ;;  %767 = vrot.lane.b32.xlu2 %v3626_v2, %s3438_s15 }
  0x68   : > { %761 = vrot.lane.b32.xlu1 %v3631_v9, %s3438_s15 }
  0x6f   : > { %759 = vrot.lane.b32.xlu0 %v3635_v11, %s3438_s15  ;;  %849 = vrot.lane.b32.xlu2 %v3629_v8, %s3439_s8  ;;  %s3447_s15 = smov 17  }
  0x70   : > { %853 = vrot.lane.b32.xlu1 %v3626_v2, %s3439_s8 }
  0x77   : > { %851 = vrot.lane.b32.xlu0 %v3637_v12, %s3439_s8  ;;  %845 = vrot.lane.b32.xlu2 %v3635_v11, %s3439_s8 }
  0x78   : > { %935 = vrot.lane.b32.xlu1 %v3629_v8, %s3440_s12 }
  0x7f   : > { %847 = vrot.lane.b32.xlu0 %v3631_v9, %s3439_s8  ;;  %937 = vrot.lane.b32.xlu2 %v3637_v12, %s3440_s12  ;;  %s3453_s8 = smov 55  }
  0x80   : > { %931 = vrot.lane.b32.xlu1 %v3635_v11, %s3440_s12 }
  0x87   : > { %939 = vrot.lane.b32.xlu0 %v3626_v2, %s3440_s12  ;;  %933 = vrot.lane.b32.xlu2 %v3631_v9, %s3440_s12  ;;  %s3459_s12 = smov 35  }
  0x88   : > { %1023 = vrot.lane.b32.xlu1 %v3637_v12, %s3441_s18 }
  0x8f   : > { %1021 = vrot.lane.b32.xlu0 %v3629_v8, %s3441_s18  ;;  %1025 = vrot.lane.b32.xlu2 %v3626_v2, %s3441_s18 }
  0x90   : > { %1019 = vrot.lane.b32.xlu1 %v3631_v9, %s3441_s18 }
  0x97   : > { %1017 = vrot.lane.b32.xlu0 %v3635_v11, %s3441_s18  ;;  %1107 = vrot.lane.b32.xlu2 %v3629_v8, %s3442_s23  ;;  %s3448_s18 = smov 16  }
  0x98   : > { %1111 = vrot.lane.b32.xlu1 %v3626_v2, %s3442_s23 }
  0x99   : > { %v439_v13 = vpop.permute.xlu2 %438 }
  0x9f   : > { %1109 = vrot.lane.b32.xlu0 %v3637_v12, %s3442_s23  ;;  %1103 = vrot.lane.b32.xlu2 %v3635_v11, %s3442_s23 }
  0xa0   : > { %1193 = vrot.lane.b32.xlu1 %v3629_v8, %s3443_s13 }
  0xa1   : > { %v3675_v14 = vpop.permute.xlu2 %591 }
  0xa7   : > { %1105 = vrot.lane.b32.xlu0 %v3631_v9, %s3442_s23  ;;  %1195 = vrot.lane.b32.xlu2 %v3637_v12, %s3443_s13  ;;  %s3454_s23 = smov 54  }
  0xa8   : > { %1189 = vrot.lane.b32.xlu1 %v3635_v11, %s3443_s13  ;;  %v445_v16 = vpop.permute.xlu1 %444 }
  0xa9   : > { %v3680_v15 = vpop.permute.xlu2 %587 }
  0xaf   : > { %1197 = vrot.lane.b32.xlu0 %v3626_v2, %s3443_s13  ;;  %1191 = vrot.lane.b32.xlu2 %v3631_v9, %s3443_s13  ;;  %s3460_s13 = smov 34  }
  0xb0   : > { %1281 = vrot.lane.b32.xlu1 %v3637_v12, %s3444_s16 }
  0xb1   : > { %v441_v17 = vpop.permute.xlu0 %440  ;;  %v3693_v22 = vpop.permute.xlu2 %679 }
  0xb2   : > { %v448_v18 = vsel %vm446_vm0, %v439_v13, %v441_v17  ;;  %v437_v23 = vpop.permute.xlu1 %436 }
  0xb3   : > { %v460_v20 = vsel %vm455_vm1, %v448_v18, 0  ;;  %v447_v24 = vsel %vm446_vm0, %v437_v23, %v439_v13 }
  0xb4   : > { %488 = vmatpush.bf16.msra.mxu1 %v460_v20  ;;  %v457_v26 = vsel %vm455_vm1, %v447_v24, 0 }
  0xb5   : > { %475 = vmatpush.bf16.msra.mxu0 %v457_v26 }
  0xb7   : > { %3037 = vmatmul.msk.bf16.vlgmr.msra.gmra.mxu1 %vm451_vm2, %v410_v21  ;;  %1279 = vrot.lane.b32.xlu0 %v3629_v8, %s3444_s16 }
  0xb8   : > { %555 = vmatpush.bf16.msrb.mxu1 %v527_v19  ;;  %1283 = vrot.lane.b32.xlu2 %v3626_v2, %s3444_s16 }
  0xb9   : > { %v443_v27 = vpop.permute.xlu0 %442  ;;  %542 = vmatpush.bf16.msrb.mxu0 %v524_v25  ;;  %1277 = vrot.lane.b32.xlu1 %v3631_v9, %s3444_s16  ;;  %v676_v35 = vpop.permute.xlu2 %675 }
  0xba   : > { %v449_v28 = vsel %vm446_vm0, %v441_v17, %v443_v27  ;;  %v450_v29 = vsel %vm446_vm0, %v443_v27, %v445_v16  ;;  %3036 = vmatmul.msk.bf16.vlgmr.msra.gmra.mxu0 %vm451_vm2, %v410_v21  ;;  %v596_v34 = vpop.permute.xlu1 %595  ;;  %v412_v16 = vld [vmem:[%s4371_s0 + $0xc] sm:$0xf]  ;;  %vm1801_vm0 = vcmask 56320  }
  0xbb   : > { %v463_v31 = vsel %vm455_vm1, %v449_v28, 0  ;;  %v466_v32 = vsel %vm455_vm1, %v450_v29, 0 }
  0xbc   : > { %501 = vmatpush.bf16.msra.mxu2 %v463_v31  ;;  %514 = vmatpush.bf16.msra.mxu3 %v466_v32  ;;  %v413_v32 = vld [vmem:[%s4371_s0 + $0x10] sm:$0xf] }
  0xbf   : > { %3038 = vmatmul.msk.bf16.vlgmr.msra.gmra.mxu2 %vm451_vm2, %v410_v21  ;;  %3039 = vmatmul.msk.bf16.vlgmr.msra.gmra.mxu3 %vm451_vm2, %v410_v21 }
  0xc0   : > { %568 = vmatpush.bf16.msrb.mxu2 %v530_v30  ;;  %581 = vmatpush.bf16.msrb.mxu3 %v533_v33 }
  0xc1   : > { %1275 = vrot.lane.b32.xlu0 %v3635_v11, %s3444_s16  ;;  %1365 = vrot.lane.b32.xlu2 %v3629_v8, %s3445_s17  ;;  %v594_v36 = vpop.permute.xlu0 %593  ;;  %v768_v44 = vpop.permute.xlu2 %767 }
  0xc2   : > { %v600_v37 = vsel %vm597_vm3, %v3675_v14, %v594_v36  ;;  %v601_v38 = vsel %vm597_vm3, %v594_v36, %v596_v34  ;;  %v678_v42 = vpop.permute.xlu1 %677  ;;  %1369 = vrot.lane.b32.xlu1 %v3626_v2, %s3445_s17 }
  0xc3   : > { %v612_v39 = vsel %vm455_vm1, %v600_v37, 0  ;;  %v615_v40 = vsel %vm455_vm1, %v601_v38, 0  ;;  %v685_v43 = vsel %vm683_vm4, %v676_v35, %v678_v42  ;;  %v686_v48 = vsel %vm683_vm4, %v678_v42, %v3693_v22 }
  0xc4   : > { %650 = vmatpush.bf16.msra.mxu2 %v612_v39  ;;  %663 = vmatpush.bf16.msra.mxu3 %v615_v40  ;;  %v695_v49 = vsel %vm455_vm1, %v685_v43, 0  ;;  %v698_v52 = vsel %vm455_vm1, %v686_v48, 0 }
  0xc7   : > { %3041 = vmatmul.msk.bf16.vlgmr.msrb.gmra.mxu1 %vm451_vm2, %v409_v41 }
  0xc9   : > { %1367 = vrot.lane.b32.xlu0 %v3637_v12, %s3445_s17  ;;  %1361 = vrot.lane.b32.xlu2 %v3635_v11, %s3445_s17  ;;  %v590_v45 = vpop.permute.xlu0 %589  ;;  %v850_v57 = vpop.permute.xlu2 %849 }
  0xca   : > { %v598_v46 = vsel %vm597_vm3, %v3680_v15, %v590_v45  ;;  %v599_v47 = vsel %vm597_vm3, %v590_v45, %v3675_v14  ;;  %3040 = vmatmul.msk.bf16.vlgmr.msrb.gmra.mxu0 %vm451_vm2, %v409_v41  ;;  %v674_v53 = vpop.permute.xlu1 %673  ;;  %1451 = vrot.lane.b32.xlu1 %v3629_v8, %s3446_s20  ;;  %vm1887_vm3 = vcmask 48128  }
  0xcb   : > { %v606_v50 = vsel %vm455_vm1, %v598_v46, 0  ;;  %v609_v51 = vsel %vm455_vm1, %v599_v47, 0  ;;  %v684_v54 = vsel %vm683_vm4, %v674_v53, %v676_v35  ;;  %v414_v46 = vld [vmem:[%s4371_s0 + $0x14] sm:$0xf] }
  0xcc   : > { %637 = vmatpush.bf16.msra.mxu1 %v609_v51  ;;  %624 = vmatpush.bf16.msra.mxu0 %v606_v50  ;;  %v692_v55 = vsel %vm455_vm1, %v684_v54, 0 }
  0xcf   : > { %3042 = vmatmul.msk.bf16.vlgmr.msrb.gmra.mxu2 %vm451_vm2, %v409_v41  ;;  %3043 = vmatmul.msk.bf16.vlgmr.msrb.gmra.mxu3 %vm451_vm2, %v409_v41 }
  0xd0   : > { %723 = vmatpush.bf16.msrb.mxu1 %v695_v49  ;;  %736 = vmatpush.bf16.msrb.mxu2 %v698_v52 }
  0xd1   : > { %1363 = vrot.lane.b32.xlu0 %v3631_v9, %s3445_s17  ;;  %v682_v56 = vpop.permute.xlu0 %681  ;;  %710 = vmatpush.bf16.msrb.mxu0 %v692_v55  ;;  %v846_v3 = vpop.permute.xlu2 %845  ;;  %s3450_s17 = smov 7  }
  0xd2   : > { %1453 = vrot.lane.b32.xlu2 %v3637_v12, %s3446_s20  ;;  %v687_v58 = vsel %vm683_vm4, %v3693_v22, %v682_v56  ;;  %v766_v61 = vpop.permute.xlu1 %765  ;;  %1447 = vrot.lane.b32.xlu1 %v3635_v11, %s3446_s20  ;;  %vm1973_vm4 = vcmask 457728  }
  0xd3   : > { %v701_v59 = vsel %vm455_vm1, %v687_v58, 0  ;;  %v773_v1 = vsel %vm769_vm5, %v766_v61, %v768_v44 }
  0xd4   : > { %749 = vmatpush.bf16.msrb.mxu3 %v701_v59  ;;  %v787_v5 = vsel %vm455_vm1, %v773_v1, 0 }
  0xd7   : > { %3045 = vmatmul.msk.bf16.vlgmr.msra.gmra.mxu1 %vm451_vm2, %v411_v60 }
  0xd9   : > { %1455 = vrot.lane.b32.xlu0 %v3626_v2, %s3446_s20  ;;  %v764_v62 = vpop.permute.xlu0 %763  ;;  %v938_v17 = vpop.permute.xlu2 %937 }
  0xda   : > { %1449 = vrot.lane.b32.xlu2 %v3631_v9, %s3446_s20  ;;  %v772_v63 = vsel %vm769_vm5, %v764_v62, %v766_v61  ;;  %3044 = vmatmul.msk.bf16.vlgmr.msra.gmra.mxu0 %vm451_vm2, %v411_v60  ;;  %v762_v6 = vpop.permute.xlu1 %761  ;;  %s3331_s20 = scalar_lea.hbm %s4375_s4, 64 }
  0xdb   : > { %v784_v4 = vsel %vm455_vm1, %v772_v63, 0  ;;  %1539 = vrot.lane.b32.xlu1 %v3637_v12, %s3447_s15  ;;  %v771_v7 = vsel %vm769_vm5, %v762_v6, %v764_v62 }
  0xdc   : > { %v781_v10 = vsel %vm455_vm1, %v771_v7, 0 }
  0xdd   : > { %809 = vmatpush.bf16.msra.mxu1 %v781_v10 }
  0xdf   : > { %3046 = vmatmul.msk.bf16.vlgmr.msra.gmra.mxu2 %vm451_vm2, %v411_v60  ;;  %3047 = vmatmul.msk.bf16.vlgmr.msra.gmra.mxu3 %vm451_vm2, %v411_v60  ;;  %v415_v60 = vld [vmem:[%s4371_s0 + $0x18] sm:$0xf] }
  0xe0   : > { %822 = vmatpush.bf16.msra.mxu2 %v784_v4  ;;  %835 = vmatpush.bf16.msra.mxu3 %v787_v5 }
  0xe1   : > { %v760_v13 = vpop.permute.xlu0 %759  ;;  %1537 = vrot.lane.b32.xlu0 %v3629_v8, %s3447_s15  ;;  %v934_v25 = vpop.permute.xlu2 %933 }
  0xe2   : > { %v770_v14 = vsel %vm769_vm5, %v760_v13, %v762_v6  ;;  %1541 = vrot.lane.b32.xlu2 %v3626_v2, %s3447_s15  ;;  %v854_v18 = vpop.permute.xlu1 %853  ;;  %vm2059_vm5 = vcmask 449536  }
  0xe3   : > { %v778_v15 = vsel %vm455_vm1, %v770_v14, 0  ;;  %1535 = vrot.lane.b32.xlu1 %v3631_v9, %s3447_s15 }
  0xe4   : > { %796 = vmatpush.bf16.msra.mxu0 %v778_v15 }
  0xe7   : > { %3049 = vmatmul.msk.bf16.vlgmr.msrb.gmra.mxu1 %vm451_vm2, %v412_v16 }
  0xe9   : > { %v852_v19 = vpop.permute.xlu0 %851  ;;  %1533 = vrot.lane.b32.xlu0 %v3635_v11, %s3447_s15  ;;  %v1026_v35 = vpop.permute.xlu2 %1025 }
  0xea   : > { %v858_v20 = vsel %vm855_vm6, %v850_v57, %v852_v19  ;;  %v859_v21 = vsel %vm855_vm6, %v852_v19, %v854_v18  ;;  %1623 = vrot.lane.b32.xlu2 %v3629_v8, %s3448_s18  ;;  %3048 = vmatmul.msk.bf16.vlgmr.msrb.gmra.mxu0 %vm451_vm2, %v412_v16  ;;  %v936_v24 = vpop.permute.xlu1 %935 }
  0xeb   : > { %v870_v22 = vsel %vm455_vm1, %v858_v20, 0  ;;  %v873_v23 = vsel %vm455_vm1, %v859_v21, 0  ;;  %1627 = vrot.lane.b32.xlu1 %v3626_v2, %s3448_s18  ;;  %v943_v29 = vsel %vm941_vm7, %v934_v25, %v936_v24  ;;  %v944_v38 = vsel %vm941_vm7, %v936_v24, %v938_v17 }
  0xec   : > { %v953_v33 = vsel %vm455_vm1, %v943_v29, 0  ;;  %v956_v41 = vsel %vm455_vm1, %v944_v38, 0 }
  0xef   : > { %3050 = vmatmul.msk.bf16.vlgmr.msrb.gmra.mxu2 %vm451_vm2, %v412_v16  ;;  %3051 = vmatmul.msk.bf16.vlgmr.msrb.gmra.mxu3 %vm451_vm2, %v412_v16 }
  0xf0   : > { %908 = vmatpush.bf16.msrb.mxu2 %v870_v22  ;;  %921 = vmatpush.bf16.msrb.mxu3 %v873_v23 }
  0xf1   : > { %v848_v26 = vpop.permute.xlu0 %847  ;;  %1625 = vrot.lane.b32.xlu0 %v3637_v12, %s3448_s18  ;;  %v1108_v45 = vpop.permute.xlu2 %1107 }
  0xf2   : > { %v857_v27 = vsel %vm855_vm6, %v848_v26, %v850_v57  ;;  %v856_v28 = vsel %vm855_vm6, %v846_v3, %v848_v26  ;;  %1619 = vrot.lane.b32.xlu2 %v3635_v11, %s3448_s18  ;;  %v932_v34 = vpop.permute.xlu1 %931  ;;  %vm2145_vm6 = vcmask 441344  }
  0xf3   : > { %v867_v30 = vsel %vm455_vm1, %v857_v27, 0  ;;  %v864_v31 = vsel %vm455_vm1, %v856_v28, 0  ;;  %1709 = vrot.lane.b32.xlu1 %v3629_v8, %s3449_s10  ;;  %v942_v36 = vsel %vm941_vm7, %v932_v34, %v934_v25 }
  0xf4   : > { %895 = vmatpush.bf16.msrb.mxu1 %v867_v30  ;;  %882 = vmatpush.bf16.msrb.mxu0 %v864_v31  ;;  %v950_v40 = vsel %vm455_vm1, %v942_v36, 0 }
  0xf7   : > { %3053 = vmatmul.msk.bf16.vlgmr.msra.gmra.mxu1 %vm451_vm2, %v413_v32 }
  0xf8   : > { %981 = vmatpush.bf16.msra.mxu1 %v953_v33  ;;  %v417_v33 = vld [vmem:[%s4371_s0 + $0x20] sm:$0xf] }
  0xf9   : > { %v940_v37 = vpop.permute.xlu0 %939  ;;  %1621 = vrot.lane.b32.xlu0 %v3631_v9, %s3448_s18  ;;  %v1104_v55 = vpop.permute.xlu2 %1103 }
  0xfa   : > { %v945_v39 = vsel %vm941_vm7, %v938_v17, %v940_v37  ;;  %1711 = vrot.lane.b32.xlu2 %v3637_v12, %s3449_s10  ;;  %3052 = vmatmul.msk.bf16.vlgmr.msra.gmra.mxu0 %vm451_vm2, %v413_v32  ;;  %v1024_v43 = vpop.permute.xlu1 %1023  ;;  %v416_v17 = vld [vmem:[%s4371_s0 + $0x1c] sm:$0xf]  ;;  %vm2231_vm7 = vcmask 375808  }
  0xfb   : > { %v959_v42 = vsel %vm455_vm1, %v945_v39, 0  ;;  %968 = vmatpush.bf16.msra.mxu0 %v950_v40  ;;  %1705 = vrot.lane.b32.xlu1 %v3635_v11, %s3449_s10  ;;  %v1031_v52 = vsel %vm1027_vm8, %v1024_v43, %v1026_v35  ;;  %v406_v35 = vunpack.c.h.b16 %v3620_v0 }
  0xfc   : > { %v1045_v57 = vsel %vm455_vm1, %v1031_v52, 0 }
  0xfd   : > { %v3894_v36 = vpack.c.b16 %v406_v35, %v406_v35 }
  0xff   : > { %3054 = vmatmul.msk.bf16.vlgmr.msra.gmra.mxu2 %vm451_vm2, %v413_v32  ;;  %3055 = vmatmul.msk.bf16.vlgmr.msra.gmra.mxu3 %vm451_vm2, %v413_v32 }
 0x100   : > { %994 = vmatpush.bf16.msra.mxu2 %v956_v41  ;;  %1007 = vmatpush.bf16.msra.mxu3 %v959_v42 }
 0x101   : > { %v1022_v44 = vpop.permute.xlu0 %1021  ;;  %1713 = vrot.lane.b32.xlu0 %v3626_v2, %s3449_s10  ;;  %v1196_v61 = vpop.permute.xlu2 %1195 }
 0x102   : > { %1707 = vrot.lane.b32.xlu2 %v3631_v9, %s3449_s10  ;;  %v1020_v47 = vpop.permute.xlu1 %1019  ;;  %v1030_v51 = vsel %vm1027_vm8, %v1022_v44, %v1024_v43  ;;  %s337_s10 = sand.u32 1, %s3397_s22  }
 0x103   : > { %1797 = vrot.lane.b32.xlu1 %v3637_v12, %s3450_s17  ;;  %v1029_v48 = vsel %vm1027_vm8, %v1020_v47, %v1022_v44  ;;  %v1042_v56 = vsel %vm455_vm1, %v1030_v51, 0 }
 0x104   : > { %v1039_v49 = vsel %vm455_vm1, %v1029_v48, 0 }
 0x107   : > { %3057 = vmatmul.msk.bf16.vlgmr.msrb.gmra.mxu1 %vm451_vm2, %v414_v46 }
 0x108   : > { %1067 = vmatpush.bf16.msrb.mxu1 %v1039_v49 }
 0x109   : > { %v1018_v50 = vpop.permute.xlu0 %1017  ;;  %1795 = vrot.lane.b32.xlu0 %v3629_v8, %s3450_s17 }
 0x10a   : > { %v1028_v53 = vsel %vm1027_vm8, %v1018_v50, %v1020_v47  ;;  %1799 = vrot.lane.b32.xlu2 %v3626_v2, %s3450_s17  ;;  %3056 = vmatmul.msk.bf16.vlgmr.msrb.gmra.mxu0 %vm451_vm2, %v414_v46  ;;  %v1112_v58 = vpop.permute.xlu1 %1111  ;;  %vm2317_vm8 = vcmask 367616  }
 0x10b   : > { %v1036_v54 = vsel %vm455_vm1, %v1028_v53, 0  ;;  %1793 = vrot.lane.b32.xlu1 %v3631_v9, %s3450_s17  ;;  %v418_v53 = vld [vmem:[%s4371_s0 + $0x24] sm:$0xf] }
 0x10c   : > { %1054 = vmatpush.bf16.msrb.mxu0 %v1036_v54 }
 0x10f   : > { %3058 = vmatmul.msk.bf16.vlgmr.msrb.gmra.mxu2 %vm451_vm2, %v414_v46  ;;  %3059 = vmatmul.msk.bf16.vlgmr.msrb.gmra.mxu3 %vm451_vm2, %v414_v46 }
 0x110   : > { %1080 = vmatpush.bf16.msrb.mxu2 %v1042_v56  ;;  %1093 = vmatpush.bf16.msrb.mxu3 %v1045_v57 }
 0x111   : > { %v1110_v59 = vpop.permute.xlu0 %1109  ;;  %1791 = vrot.lane.b32.xlu0 %v3635_v11, %s3450_s17  ;;  %s3032_s17 = sshll.u32 %s3421_s28, 1 }
 0x112   : > { %1881 = vrot.lane.b32.xlu2 %v3629_v8, %s3451_s9  ;;  %v1194_v62 = vpop.permute.xlu1 %1193  ;;  %v1116_v1 = vsel %vm1113_vm9, %v1108_v45, %v1110_v59  ;;  %v1117_v5 = vsel %vm1113_vm9, %v1110_v59, %v1112_v58 }
 0x113   : > { %1885 = vrot.lane.b32.xlu1 %v3626_v2, %s3451_s9  ;;  %v1128_v10 = vsel %vm455_vm1, %v1116_v1, 0  ;;  %v1131_v13 = vsel %vm455_vm1, %v1117_v5, 0  ;;  %v1202_v23 = vsel %vm1199_vm10, %v1194_v62, %v1196_v61 }
 0x114   : > { %v1214_v26 = vsel %vm455_vm1, %v1202_v23, 0 }
 0x117   : > { %3061 = vmatmul.msk.bf16.vlgmr.msra.gmra.mxu1 %vm451_vm2, %v415_v60 }
 0x119   : > { %v1106_v63 = vpop.permute.xlu0 %1105  ;;  %1883 = vrot.lane.b32.xlu0 %v3637_v12, %s3451_s9 }
 0x11a   : > { %v1115_v3 = vsel %vm1113_vm9, %v1106_v63, %v1108_v45  ;;  %v1114_v4 = vsel %vm1113_vm9, %v1104_v55, %v1106_v63  ;;  %1877 = vrot.lane.b32.xlu2 %v3635_v11, %s3451_s9  ;;  %3060 = vmatmul.msk.bf16.vlgmr.msra.gmra.mxu0 %vm451_vm2, %v415_v60  ;;  %v1190_v14 = vpop.permute.xlu1 %1189  ;;  %v1192_v11 = vpop.permute.xlu2 %1191  ;;  %vm2403_vm9 = vcmask 359424  }
 0x11b   : > { %v1125_v6 = vsel %vm455_vm1, %v1115_v3, 0  ;;  %v1122_v7 = vsel %vm455_vm1, %v1114_v4, 0  ;;  %1967 = vrot.lane.b32.xlu1 %v3637_v12, %s3452_s24  ;;  %v1201_v16 = vsel %vm1199_vm10, %v1192_v11, %v1194_v62  ;;  %v1200_v21 = vsel %vm1199_vm10, %v1190_v14, %v1192_v11 }
 0x11c   : > { %1153 = vmatpush.bf16.msra.mxu1 %v1125_v6  ;;  %1140 = vmatpush.bf16.msra.mxu0 %v1122_v7  ;;  %v1211_v18 = vsel %vm455_vm1, %v1201_v16, 0  ;;  %v1208_v25 = vsel %vm455_vm1, %v1200_v21, 0  ;;  %v419_v21 = vld [vmem:[%s4371_s0 + $0x28] sm:$0xf] }
 0x11f   : > { %3062 = vmatmul.msk.bf16.vlgmr.msra.gmra.mxu2 %vm451_vm2, %v415_v60  ;;  %3063 = vmatmul.msk.bf16.vlgmr.msra.gmra.mxu3 %vm451_vm2, %v415_v60 }
 0x120   : > { %1166 = vmatpush.bf16.msra.mxu2 %v1128_v10  ;;  %1179 = vmatpush.bf16.msra.mxu3 %v1131_v13 }
 0x121   : > { %v1198_v15 = vpop.permute.xlu0 %1197  ;;  %1879 = vrot.lane.b32.xlu0 %v3631_v9, %s3451_s9  ;;  %s3456_s9 = smov 45  }
 0x122   : > { %1969 = vrot.lane.b32.xlu2 %v3626_v2, %s3452_s24  ;;  %v1282_v19 = vpop.permute.xlu1 %1281  ;;  %v1284_v20 = vpop.permute.xlu2 %1283  ;;  %v1203_v24 = vsel %vm1199_vm10, %v1196_v61, %v1198_v15  ;;  %vm2489_vm10 = vcmask 293888  }
 0x123   : > { %1963 = vrot.lane.b32.xlu1 %v3631_v9, %s3452_s24  ;;  %v1217_v27 = vsel %vm455_vm1, %v1203_v24, 0  ;;  %v1289_v40 = vsel %vm1285_vm11, %v1282_v19, %v1284_v20 }
 0x124   : > { %v1303_v46 = vsel %vm455_vm1, %v1289_v40, 0 }
 0x127   : > { %3065 = vmatmul.msk.bf16.vlgmr.msrb.gmra.mxu1 %vm451_vm2, %v416_v17 }
 0x128   : > { %1239 = vmatpush.bf16.msrb.mxu1 %v1211_v18 }
 0x129   : > { %v1280_v22 = vpop.permute.xlu0 %1279  ;;  %1971 = vrot.lane.b32.xlu0 %v3894_v36, %s3452_s24 }
 0x12a   : > { %1965 = vrot.lane.b32.xlu2 %v3629_v8, %s3452_s24  ;;  %3064 = vmatmul.msk.bf16.vlgmr.msrb.gmra.mxu0 %vm451_vm2, %v416_v17  ;;  %v1366_v29 = vpop.permute.xlu2 %1365  ;;  %v1288_v0 = vsel %vm1285_vm11, %v1280_v22, %v1282_v19  ;;  %s3457_s24 = smov 44  }
 0x12b   : > { %1226 = vmatpush.bf16.msrb.mxu0 %v1208_v25  ;;  %2055 = vrot.lane.b32.xlu1 %v3626_v2, %s3453_s8  ;;  %v1278_v28 = vpop.permute.xlu1 %1277  ;;  %v1300_v45 = vsel %vm455_vm1, %v1288_v0, 0 }
 0x12c   : > { %v1287_v31 = vsel %vm1285_vm11, %v1278_v28, %v1280_v22 }
 0x12d   : > { %v1297_v34 = vsel %vm455_vm1, %v1287_v31, 0 }
 0x12f   : > { %3066 = vmatmul.msk.bf16.vlgmr.msrb.gmra.mxu2 %vm451_vm2, %v416_v17  ;;  %3067 = vmatmul.msk.bf16.vlgmr.msrb.gmra.mxu3 %vm451_vm2, %v416_v17 }
 0x130   : > { %1252 = vmatpush.bf16.msrb.mxu2 %v1214_v26  ;;  %1265 = vmatpush.bf16.msrb.mxu3 %v1217_v27 }
 0x131   : > { %2053 = vrot.lane.b32.xlu0 %v3637_v12, %s3453_s8 }
 0x132   : > { %2057 = vrot.lane.b32.xlu2 %v3894_v36, %s3453_s8  ;;  %v1362_v43 = vpop.permute.xlu2 %1361 }
 0x133   : > { %v1276_v30 = vpop.permute.xlu0 %1275  ;;  %2051 = vrot.lane.b32.xlu1 %v3629_v8, %s3453_s8 }
 0x134   : > { %v490_v32 = vpop.f32.mrf.mxu1  ;;  %v1286_v37 = vsel %vm1285_vm11, %v1276_v30, %v1278_v28  ;;  %v1370_v38 = vpop.permute.xlu1 %1369  ;;  %vm2575_vm11 = vcmask 285696  }
 0x135   : > { %v1294_v42 = vsel %vm455_vm1, %v1286_v37, 0 }
 0x137   : > { %3069 = vmatmul.msk.bf16.vlgmr.msra.gmra.mxu1 %vm451_vm2, %v417_v33  ;;  %v477_v39 = vpop.f32.mrf.mxu0 }
 0x138   : > { %1325 = vmatpush.bf16.msra.mxu1 %v1297_v34 }
 0x139   : > { %2049 = vrot.lane.b32.xlu0 %v3631_v9, %s3453_s8 }
 0x13a   : > { %3068 = vmatmul.msk.bf16.vlgmr.msra.gmra.mxu0 %vm451_vm2, %v417_v33  ;;  %2139 = vrot.lane.b32.xlu2 %v3637_v12, %s3454_s23  ;;  %v1454_v57 = vpop.permute.xlu2 %1453 }
 0x13b   : > { %v1368_v41 = vpop.permute.xlu0 %1367  ;;  %1312 = vmatpush.bf16.msra.mxu0 %v1294_v42  ;;  %2143 = vrot.lane.b32.xlu1 %v3894_v36, %s3454_s23 }
 0x13c   : > { %v492_v44 = vpop.f32.mrf.mxu1  ;;  %v3911_v47 = vpop.permute.xlu1 %1451  ;;  %v1374_v62 = vsel %vm1371_vm12, %v1366_v29, %v1368_v41  ;;  %v1375_v63 = vsel %vm1371_vm12, %v1368_v41, %v1370_v38 }
 0x13d   : > { %v1386_v7 = vsel %vm455_vm1, %v1374_v62, 0  ;;  %v1389_v10 = vsel %vm455_vm1, %v1375_v63, 0 }
 0x13f   : > { %3070 = vmatmul.msk.bf16.vlgmr.msra.gmra.mxu2 %vm451_vm2, %v417_v33  ;;  %3071 = vmatmul.msk.bf16.vlgmr.msra.gmra.mxu3 %vm451_vm2, %v417_v33  ;;  %v479_v48 = vpop.f32.mrf.mxu0 }
 0x140   : > { %1338 = vmatpush.bf16.msra.mxu2 %v1300_v45  ;;  %1351 = vmatpush.bf16.msra.mxu3 %v1303_v46 }
 0x141   : > { %2141 = vrot.lane.b32.xlu0 %v3626_v2, %s3454_s23 }
 0x142   : > { %v503_v49 = vpop.f32.mrf.mxu2  ;;  %v516_v50 = vpop.f32.mrf.mxu3  ;;  %2135 = vrot.lane.b32.xlu2 %v3631_v9, %s3454_s23 }
 0x143   : > { %v1364_v51 = vpop.permute.xlu0 %1363  ;;  %2225 = vrot.lane.b32.xlu1 %v3637_v12, %s3455_s14  ;;  %v1450_v13 = vpop.permute.xlu2 %1449 }
 0x144   : > { %v557_v52 = vpop.f32.mrf.mxu1  ;;  %v1373_v54 = vsel %vm1371_vm12, %v1364_v51, %v1366_v29  ;;  %v1372_v58 = vsel %vm1371_vm12, %v1362_v43, %v1364_v51  ;;  %v1448_v59 = vpop.permute.xlu1 %1447  ;;  %v1459_v15 = vsel %vm1457_vm13, %v1450_v13, %v3911_v47  ;;  %v1460_v29 = vsel %vm1457_vm13, %v3911_v47, %v1454_v57  ;;  %v420_v47 = vld [vmem:[%s4371_s0 + $0x2c] sm:$0xf] }
 0x145   : > { %v558_v55 = vadd.f32 %v557_v52, %v490_v32  ;;  %v1383_v56 = vsel %vm455_vm1, %v1373_v54, 0  ;;  %v1380_v4 = vsel %vm455_vm1, %v1372_v58, 0  ;;  %v1469_v23 = vsel %vm455_vm1, %v1459_v15, 0 }
 0x146   : > { %v1458_v26 = vsel %vm1457_vm13, %v1448_v59, %v1450_v13  ;;  %v1472_v37 = vsel %vm455_vm1, %v1460_v29, 0  ;;  %vm2661_vm12 = vcmask 277504  }
 0x147   : > { %3073 = vmatmul.msk.bf16.vlgmr.msrb.gmra.mxu1 %vm451_vm2, %v418_v53  ;;  %v544_v61 = vpop.f32.mrf.mxu0  ;;  %v1466_v33 = vsel %vm455_vm1, %v1458_v26, 0 }
 0x148   : > { %1411 = vmatpush.bf16.msrb.mxu1 %v1383_v56  ;;  %v545_v3 = vadd.f32 %v544_v61, %v477_v39 }
 0x149   : > { %2137 = vrot.lane.b32.xlu0 %v3629_v8, %s3454_s23 }
 0x14a   : > { %v505_v60 = vpop.f32.mrf.mxu2  ;;  %v518_v1 = vpop.f32.mrf.mxu3  ;;  %3072 = vmatmul.msk.bf16.vlgmr.msrb.gmra.mxu0 %vm451_vm2, %v418_v53  ;;  %2227 = vrot.lane.b32.xlu2 %v3626_v2, %s3455_s14 }
 0x14b   : > { %v1456_v5 = vpop.permute.xlu0 %1455  ;;  %1398 = vmatpush.bf16.msrb.mxu0 %v1380_v4  ;;  %2221 = vrot.lane.b32.xlu1 %v3631_v9, %s3455_s14  ;;  %v1542_v25 = vpop.permute.xlu2 %1541 }
 0x14c   : > { %v559_v6 = vpop.f32.mrf.mxu1  ;;  %v1461_v30 = vsel %vm1457_vm13, %v1454_v57, %v1456_v5 }
 0x14d   : > { %v1540_v24 = vpop.permute.xlu1 %1539  ;;  %v1475_v38 = vsel %vm455_vm1, %v1461_v30, 0 }
 0x14e   : > { %v1547_v56 = vsel %vm1543_vm14, %v1540_v24, %v1542_v25 }
 0x14f   : > { %3074 = vmatmul.msk.bf16.vlgmr.msrb.gmra.mxu2 %vm451_vm2, %v418_v53  ;;  %3075 = vmatmul.msk.bf16.vlgmr.msrb.gmra.mxu3 %vm451_vm2, %v418_v53  ;;  %v546_v14 = vpop.f32.mrf.mxu0  ;;  %v1561_v63 = vsel %vm455_vm1, %v1547_v56, 0 }
 0x150   : > { %1424 = vmatpush.bf16.msrb.mxu2 %v1386_v7  ;;  %1437 = vmatpush.bf16.msrb.mxu3 %v1389_v10 }
 0x151   : > { %2229 = vrot.lane.b32.xlu0 %v3894_v36, %s3455_s14 }
 0x152   : > { %v570_v11 = vpop.f32.mrf.mxu2  ;;  %v583_v17 = vpop.f32.mrf.mxu3  ;;  %2223 = vrot.lane.b32.xlu2 %v3629_v8, %s3455_s14  ;;  %s3028_s14 = sshll.u32 %s337_s10, 4 }
 0x153   : > { %v571_v16 = vadd.f32 %v570_v11, %v503_v49  ;;  %v1538_v18 = vpop.permute.xlu0 %1537  ;;  %v584_v19 = vadd.f32 %v583_v17, %v516_v50  ;;  %2313 = vrot.lane.b32.xlu1 %v3626_v2, %s3456_s9  ;;  %v3969_v0 = vpop.permute.xlu2 %1623  ;;  %v421_v11 = vld [vmem:[%s4371_s0 + $0x30] sm:$0xf]  ;;  %s4287_s16 = scalar_lea.vmem [#allocation5], %s3028_s14 }
 0x154   : > { %v639_v20 = vpop.f32.mrf.mxu1 }
 0x155   : > { %v670_v22 = vadd.f32 %v639_v20, %v558_v55  ;;  %v1536_v39 = vpop.permute.xlu1 %1535  ;;  %v1546_v55 = vsel %vm1543_vm14, %v1538_v18, %v1540_v24 }
 0x156   : > { %v1545_v42 = vsel %vm1543_vm14, %v1536_v39, %v1538_v18  ;;  %v1558_v62 = vsel %vm455_vm1, %v1546_v55, 0 }
 0x157   : > { %3077 = vmatmul.msk.bf16.vlgmr.msra.gmra.mxu1 %vm451_vm2, %v419_v21  ;;  %v626_v28 = vpop.f32.mrf.mxu0  ;;  %v1555_v49 = vsel %vm455_vm1, %v1545_v42, 0 }
 0x158   : > { %1497 = vmatpush.bf16.msra.mxu1 %v1469_v23  ;;  %v669_v32 = vadd.f32 %v626_v28, %v545_v3 }
 0x159   : > { %2311 = vrot.lane.b32.xlu0 %v3637_v12, %s3456_s9 }
 0x15a   : > { %v572_v27 = vpop.f32.mrf.mxu2  ;;  %v585_v31 = vpop.f32.mrf.mxu3  ;;  %3076 = vmatmul.msk.bf16.vlgmr.msra.gmra.mxu0 %vm451_vm2, %v419_v21  ;;  %2315 = vrot.lane.b32.xlu2 %v3894_v36, %s3456_s9 }
 0x15b   : > { %v1534_v34 = vpop.permute.xlu0 %1533  ;;  %1484 = vmatpush.bf16.msra.mxu0 %v1466_v33  ;;  %2309 = vrot.lane.b32.xlu1 %v3629_v8, %s3456_s9  ;;  %v1620_v60 = vpop.permute.xlu2 %1619 }
 0x15c   : > { %v641_v35 = vpop.f32.mrf.mxu1  ;;  %v1544_v52 = vsel %vm1543_vm14, %v1534_v34, %v1536_v39 }
 0x15d   : > { %v1628_v51 = vpop.permute.xlu1 %1627  ;;  %v1552_v59 = vsel %vm455_vm1, %v1544_v52, 0 }
 0x15f   : > { %3078 = vmatmul.msk.bf16.vlgmr.msra.gmra.mxu2 %vm451_vm2, %v419_v21  ;;  %3079 = vmatmul.msk.bf16.vlgmr.msra.gmra.mxu3 %vm451_vm2, %v419_v21  ;;  %v628_v40 = vpop.f32.mrf.mxu0 }
 0x160   : > { %1510 = vmatpush.bf16.msra.mxu2 %v1472_v37  ;;  %1523 = vmatpush.bf16.msra.mxu3 %v1475_v38  ;;  %v422_v40 = vld [vmem:[%s4371_s0 + $0x34] sm:$0xf] }
 0x161   : > { %2307 = vrot.lane.b32.xlu0 %v3631_v9, %s3456_s9  ;;  %s375_s9 = sadd.s32 %s3417_s27, %s3032_s17 }
 0x162   : > { %v652_v41 = vpop.f32.mrf.mxu2  ;;  %v665_v44 = vpop.f32.mrf.mxu3  ;;  %2397 = vrot.lane.b32.xlu2 %v3637_v12, %s3457_s24  ;;  %p376_p10 = scmp.lt.s32.totalorder %s375_s9, 3 }
 0x163   : > { %v671_v43 = vadd.f32 %v652_v41, %v571_v16  ;;  %v672_v45 = vadd.f32 %v665_v44, %v584_v19  ;;  %v1626_v50 = vpop.permute.xlu0 %1625  ;;  %2401 = vrot.lane.b32.xlu1 %v3894_v36, %s3457_s24  ;;  %v1712_v17 = vpop.permute.xlu2 %1711 }
 0x164   : > { %v725_v46 = vpop.f32.mrf.mxu1  ;;  %v1633_v23 = vsel %vm1629_vm15, %v1626_v50, %v1628_v51  ;;  %s4417_s9 = smov (!%p376_p10, %s375_s9), 3 }
 0x165   : > { %v756_v48 = vadd.f32 %v725_v46, %v670_v22  ;;  %v3998_v3 = vpop.permute.xlu1 %1709  ;;  %v1632_v22 = vsel %vm1629_vm15, %v3969_v0, %v1626_v50  ;;  %v1647_v30 = vsel %vm455_vm1, %v1633_v23, 0  ;;  %s3033_s19 = sshll.u32 %s4417_s9, 3 }
 0x166   : > { %v1644_v29 = vsel %vm455_vm1, %v1632_v22, 0 }
 0x167   : > { %3081 = vmatmul.msk.bf16.vlgmr.msrb.gmra.mxu1 %vm451_vm2, %v420_v47  ;;  %v712_v54 = vpop.f32.mrf.mxu0 }
 0x168   : > { %1583 = vmatpush.bf16.msrb.mxu1 %v1555_v49  ;;  %v755_v58 = vadd.f32 %v712_v54, %v669_v32 }
 0x169   : > { %2399 = vrot.lane.b32.xlu0 %v3626_v2, %s3457_s24 }
 0x16a   : > { %v654_v53 = vpop.f32.mrf.mxu2  ;;  %v667_v57 = vpop.f32.mrf.mxu3  ;;  %3080 = vmatmul.msk.bf16.vlgmr.msrb.gmra.mxu0 %vm451_vm2, %v420_v47  ;;  %2393 = vrot.lane.b32.xlu2 %v3631_v9, %s3457_s24 }
 0x16b   : > { %1570 = vmatpush.bf16.msrb.mxu0 %v1552_v59  ;;  %2483 = vrot.lane.b32.xlu1 %v3637_v12, %s3458_s11  ;;  %v1622_v1 = vpop.permute.xlu0 %1621  ;;  %v1708_v31 = vpop.permute.xlu2 %1707 }
 0x16c   : > { %v727_v61 = vpop.f32.mrf.mxu1  ;;  %v1631_v6 = vsel %vm1629_vm15, %v1622_v1, %v3969_v0  ;;  %v1630_v19 = vsel %vm1629_vm15, %v1620_v60, %v1622_v1  ;;  %v1717_v35 = vsel %vm451_vm2, %v1708_v31, %v3998_v3 }
 0x16d   : > { %v1641_v16 = vsel %vm455_vm1, %v1631_v6, 0  ;;  %v1638_v26 = vsel %vm455_vm1, %v1630_v19, 0  ;;  %v1706_v27 = vpop.permute.xlu1 %1705  ;;  %v1727_v42 = vsel %vm455_vm1, %v1717_v35, 0 }
 0x16f   : > { %3082 = vmatmul.msk.bf16.vlgmr.msrb.gmra.mxu2 %vm451_vm2, %v420_v47  ;;  %3083 = vmatmul.msk.bf16.vlgmr.msrb.gmra.mxu3 %vm451_vm2, %v420_v47  ;;  %v714_v4 = vpop.f32.mrf.mxu0 }
 0x170   : > { %1596 = vmatpush.bf16.msrb.mxu2 %v1558_v62  ;;  %1609 = vmatpush.bf16.msrb.mxu3 %v1561_v63 }
 0x171   : > { %2395 = vrot.lane.b32.xlu0 %v3629_v8, %s3457_s24  ;;  %s379_s24 = scalar_lea.vmem %s4376_s5, %s3033_s19 }
 0x172   : > { %v738_v5 = vpop.f32.mrf.mxu2  ;;  %v751_v10 = vpop.f32.mrf.mxu3  ;;  %2485 = vrot.lane.b32.xlu2 %v3626_v2, %s3458_s11 }
 0x173   : > { %v757_v7 = vadd.f32 %v738_v5, %v671_v43  ;;  %v758_v13 = vadd.f32 %v751_v10, %v672_v45  ;;  %2479 = vrot.lane.b32.xlu1 %v3631_v9, %s3458_s11  ;;  %v1714_v18 = vpop.permute.xlu0 %1713  ;;  %v1800_v44 = vpop.permute.xlu2 %1799  ;;  %v1716_v45 = vsel %vm451_vm2, %v1706_v27, %v1708_v31 }
 0x174   : > { %v811_v14 = vpop.f32.mrf.mxu1  ;;  %v1719_v49 = vsel %vm451_vm2, %v1712_v17, %v1714_v18  ;;  %v1724_v52 = vsel %vm455_vm1, %v1716_v45, 0 }
 0x175   : > { %v842_v15 = vadd.f32 %v811_v14, %v756_v48  ;;  %v1798_v43 = vpop.permute.xlu1 %1797  ;;  %v1718_v48 = vsel %vm451_vm2, %v3998_v3, %v1712_v17  ;;  %v1733_v56 = vsel %vm455_vm1, %v1719_v49, 0  ;;  %v423_v3 = vld [vmem:[%s4371_s0 + $0x38] sm:$0xf] }
 0x176   : > { %v1730_v55 = vsel %vm455_vm1, %v1718_v48, 0 }
 0x177   : > { %3085 = vmatmul.msk.bf16.vlgmr.msra.gmra.mxu1 %vm451_vm2, %v421_v11  ;;  %v798_v21 = vpop.f32.mrf.mxu0 }
 0x178   : > { %1669 = vmatpush.bf16.msra.mxu1 %v1641_v16  ;;  %v841_v25 = vadd.f32 %v798_v21, %v755_v58 }
 0x179   : > { %2487 = vrot.lane.b32.xlu0 %v3894_v36, %s3458_s11 }
 0x17a   : > { %v740_v20 = vpop.f32.mrf.mxu2  ;;  %v753_v24 = vpop.f32.mrf.mxu3  ;;  %3084 = vmatmul.msk.bf16.vlgmr.msra.gmra.mxu0 %vm451_vm2, %v421_v11  ;;  %2481 = vrot.lane.b32.xlu2 %v3629_v8, %s3458_s11  ;;  %s3146_s11 = sshll.u32 %s3421_s28, 3  ;;  %s2808_s28 = scalar_lea.sflag [#allocation4], %s337_s10 }
 0x17b   : > { %1656 = vmatpush.bf16.msra.mxu0 %v1638_v26  ;;  %2571 = vrot.lane.b32.xlu1 %v3626_v2, %s3459_s12  ;;  %v4029_v32 = vpop.permute.xlu0 %1795  ;;  %v1882_v58 = vpop.permute.xlu2 %1881  ;;  %s2831_s15 = sadd.s32 %s3146_s11, %s3614_s26 }
 0x17c   : > { %v813_v28 = vpop.f32.mrf.mxu1  ;;  %v1804_v14 = vsel %vm1801_vm0, %v4029_v32, %v1798_v43  ;;  %s3147_s8 = sshll.u32 %s2831_s15, 2 }
 0x17d   : > { %v1794_v57 = vpop.permute.xlu1 %1793  ;;  %v1816_v20 = vsel %vm455_vm1, %v1804_v14, 0  ;;  %s2833_s23 = scalar_lea.hbm %s4375_s4, %s3147_s8 }
 0x17e   : > { %s2837_s14 = sshll.u32 %s2833_s23, 4  ;;  %s2838_s14 = int_to_ptr.hbm [resolvable:$true] %s2837_s14 }
 0x17f   : > { %3086 = vmatmul.msk.bf16.vlgmr.msra.gmra.mxu2 %vm451_vm2, %v421_v11  ;;  %3087 = vmatmul.msk.bf16.vlgmr.msra.gmra.mxu3 %vm451_vm2, %v421_v11  ;;  %v800_v33 = vpop.f32.mrf.mxu0  ;;  %v1805_v11 = vsel %vm1801_vm0, %v1798_v43, %v1800_v44 }
 0x180   : > { %1682 = vmatpush.bf16.msra.mxu2 %v1644_v29  ;;  %1695 = vmatpush.bf16.msra.mxu3 %v1647_v30  ;;  %v1819_v21 = vsel %vm455_vm1, %v1805_v11, 0  ;;  %v424_v30 = vld [vmem:[%s4371_s0 + $0x3c] sm:$0xf] }
 0x181   : > { %2569 = vrot.lane.b32.xlu0 %v3637_v12, %s3459_s12 }
 0x182   : > { %v824_v34 = vpop.f32.mrf.mxu2  ;;  %v837_v38 = vpop.f32.mrf.mxu3  ;;  %2573 = vrot.lane.b32.xlu2 %v3894_v36, %s3459_s12 }
 0x183   : > { %v843_v37 = vadd.f32 %v824_v34, %v757_v7  ;;  %v844_v39 = vadd.f32 %v837_v38, %v758_v13  ;;  %2567 = vrot.lane.b32.xlu1 %v3629_v8, %s3459_s12  ;;  %v1792_v53 = vpop.permute.xlu0 %1791  ;;  %v1878_v18 = vpop.permute.xlu2 %1877 }
 0x184   : > { %v897_v0 = vpop.f32.mrf.mxu1 }
 0x185   : > { %v928_v41 = vadd.f32 %v897_v0, %v842_v15  ;;  %v1886_v7 = vpop.permute.xlu1 %1885 }
 0x187   : > { %3089 = vmatmul.msk.bf16.vlgmr.msrb.gmra.mxu1 %vm451_vm2, %v422_v40  ;;  %v884_v47 = vpop.f32.mrf.mxu0 }
 0x188   : > { %1755 = vmatpush.bf16.msrb.mxu1 %v1727_v42  ;;  %v927_v51 = vadd.f32 %v884_v47, %v841_v25 }
 0x189   : > { %2565 = vrot.lane.b32.xlu0 %v3631_v9, %s3459_s12  ;;  %s370_s12 = scalar_select %p369_p7, %s3614_s26, 7 }
 0x18a   : > { %v826_v46 = vpop.f32.mrf.mxu2  ;;  %v839_v50 = vpop.f32.mrf.mxu3  ;;  %3088 = vmatmul.msk.bf16.vlgmr.msrb.gmra.mxu0 %vm451_vm2, %v422_v40  ;;  %2655 = vrot.lane.b32.xlu2 %v3637_v12, %s3460_s13  ;;  %v1802_v12 = vsel %vm1801_vm0, %v1792_v53, %v1794_v57  ;;  %s3325_s26 = sshra.s32 %s2838_s14, 4  ;;  %s3326_s26 = int_to_ptr.hbm [resolvable:$true] %s3325_s26 }
 0x18b   : > { %1742 = vmatpush.bf16.msrb.mxu0 %v1724_v52  ;;  %2659 = vrot.lane.b32.xlu1 %v3894_v36, %s3460_s13  ;;  %v1803_v36 = vsel %vm1801_vm0, %v1794_v57, %v4029_v32  ;;  %v1884_v6 = vpop.permute.xlu0 %1883  ;;  %v1810_v17 = vsel %vm455_vm1, %v1802_v12, 0  ;;  %v1970_v33 = vpop.permute.xlu2 %1969  ;;  %vm2804_vm0 = vcmask 7168   ;;  %s3327_s17 = scalar_lea.hbm %s3326_s26, 16  ;;  %p3332_p1 = scmp.lt.s32.totalorder %s3326_s26, %s4375_s4 }
 0x18c   : > { %v899_v54 = vpop.f32.mrf.mxu1  ;;  %v1813_v5 = vsel %vm455_vm1, %v1803_v36, 0  ;;  %v1890_v38 = vsel %vm1887_vm3, %v1882_v58, %v1884_v6  ;;  %p3328_p11 = scmp.ne.s32.totalorder %s3326_s26, %s3327_s17  ;;  %p3333_p4 = scmp.lt.s32.totalorder %s3331_s20, %s3327_s17 }
 0x18d   : > { %v1968_v22 = vpop.permute.xlu1 %1967  ;;  %v1902_v44 = vsel %vm455_vm1, %v1890_v38, 0  ;;  %v425_v54 = vld [vmem:[%s4371_s0 + $0x40] sm:$0xf] }
 0x18e   : > { %p3329_p13 = pnand %p3328_p11, %p3585_p12  ;;  %p3334_p5 = por %p3333_p4, %p3332_p1 }
 0x18f   : > { %3090 = vmatmul.msk.bf16.vlgmr.msrb.gmra.mxu2 %vm451_vm2, %v422_v40  ;;  %3091 = vmatmul.msk.bf16.vlgmr.msrb.gmra.mxu3 %vm451_vm2, %v422_v40  ;;  %v886_v59 = vpop.f32.mrf.mxu0 }
 0x190   : > { %1768 = vmatpush.bf16.msrb.mxu2 %v1730_v55  ;;  %1781 = vmatpush.bf16.msrb.mxu3 %v1733_v56  ;;  %p3330_p0 = pneg %p3329_p13 }
 0x191   : > { %2657 = vrot.lane.b32.xlu0 %v3626_v2, %s3460_s13 }
 0x192   : > { %v910_v60 = vpop.f32.mrf.mxu2  ;;  %v923_v62 = vpop.f32.mrf.mxu3  ;;  %2651 = vrot.lane.b32.xlu2 %v3631_v9, %s3460_s13  ;;  %p3335_p6 = pnand %p3334_p5, %p3330_p0 }
 0x193   : > { %v929_v61 = vadd.f32 %v910_v60, %v843_v37  ;;  %v930_v63 = vadd.f32 %v923_v62, %v844_v39  ;;  %v1880_v9 = vpop.permute.xlu0 %1879  ;;  %v1891_v39 = vsel %vm1887_vm3, %v1884_v6, %v1886_v7 }
 0x194   : > { %v983_v1 = vpop.f32.mrf.mxu1  ;;  %v1889_v25 = vsel %vm1887_vm3, %v1880_v9, %v1882_v58  ;;  %v1888_v2 = vsel %vm1887_vm3, %v1878_v18, %v1880_v9  ;;  %v1905_v45 = vsel %vm455_vm1, %v1891_v39, 0 }
 0x195   : > { %v1014_v4 = vadd.f32 %v983_v1, %v928_v41  ;;  %v1899_v32 = vsel %vm455_vm1, %v1889_v25, 0  ;;  %v1964_v34 = vpop.permute.xlu1 %1963  ;;  %v1896_v41 = vsel %vm455_vm1, %v1888_v2, 0 }
 0x197   : > { %3093 = vmatmul.msk.bf16.vlgmr.msra.gmra.mxu1 %vm451_vm2, %v423_v3  ;;  %v970_v13 = vpop.f32.mrf.mxu0 }
 0x198   : > { %1841 = vmatpush.bf16.msra.mxu1 %v1813_v5  ;;  %v1013_v16 = vadd.f32 %v970_v13, %v927_v51 }
 0x199   : > { %2653 = vrot.lane.b32.xlu0 %v3629_v8, %s3460_s13  ;;  %v1966_v8 = vpop.permute.xlu2 %1965  ;;  %s371_s13 = scalar_lea.vmem %s4374_s3, %s370_s12 }
 0x19a   : > { %v912_v10 = vpop.f32.mrf.mxu2  ;;  %v925_v15 = vpop.f32.mrf.mxu3  ;;  %3092 = vmatmul.msk.bf16.vlgmr.msra.gmra.mxu0 %vm451_vm2, %v423_v3  ;;  %v1975_v48 = vsel %vm1973_vm4, %v1966_v8, %v1968_v22  ;;  %v1974_v59 = vsel %vm1973_vm4, %v1964_v34, %v1966_v8 }
 0x19b   : > { %1828 = vmatpush.bf16.msra.mxu0 %v1810_v17  ;;  %v1972_v42 = vpop.permute.xlu0 %1971  ;;  %v1985_v56 = vsel %vm455_vm1, %v1975_v48, 0 }
 0x19c   : > { %v985_v19 = vpop.f32.mrf.mxu1  ;;  %v1977_v62 = vsel %vm1973_vm4, %v1970_v33, %v1972_v42 }
 0x19d   : > { %v2056_v57 = vpop.permute.xlu1 %2055  ;;  %v1991_v12 = vsel %vm455_vm1, %v1977_v62, 0  ;;  %v426_v19 = vld [vmem:[%s4371_s0 + $0x44] sm:$0xf] }
 0x19f   : > { %3094 = vmatmul.msk.bf16.vlgmr.msra.gmra.mxu2 %vm451_vm2, %v423_v3  ;;  %3095 = vmatmul.msk.bf16.vlgmr.msra.gmra.mxu3 %vm451_vm2, %v423_v3  ;;  %v972_v23 = vpop.f32.mrf.mxu0  ;;  %v1982_v3 = vsel %vm455_vm1, %v1974_v59, 0 }
 0x1a0   : > { %1854 = vmatpush.bf16.msra.mxu2 %v1816_v20  ;;  %1867 = vmatpush.bf16.msra.mxu3 %v1819_v21 }
 0x1a1   : > { %v2058_v58 = vpop.permute.xlu2 %2057 }
 0x1a2   : > { %v996_v24 = vpop.f32.mrf.mxu2  ;;  %v1009_v27 = vpop.f32.mrf.mxu3 }
 0x1a3   : > { %v1015_v26 = vadd.f32 %v996_v24, %v929_v61  ;;  %v1016_v28 = vadd.f32 %v1009_v27, %v930_v63  ;;  %v2054_v51 = vpop.permute.xlu0 %2053  ;;  %v1976_v61 = vsel %vm1973_vm4, %v1968_v22, %v1970_v33  ;;  %v2063_v27 = vsel %vm2059_vm5, %v2056_v57, %v2058_v58 }
 0x1a4   : > { %v1069_v29 = vpop.f32.mrf.mxu1  ;;  %v1988_v6 = vsel %vm455_vm1, %v1976_v61, 0  ;;  %v2077_v2 = vsel %vm455_vm1, %v2063_v27, 0 }
 0x1a5   : > { %v1100_v31 = vadd.f32 %v1069_v29, %v1014_v4  ;;  %v2052_v7 = vpop.permute.xlu1 %2051 }
 0x1a6   : > { %v2061_v11 = vsel %vm2059_vm5, %v2052_v7, %v2054_v51 }
 0x1a7   : > { %3097 = vmatmul.msk.bf16.vlgmr.msrb.gmra.mxu1 %vm451_vm2, %v424_v30  ;;  %v1056_v37 = vpop.f32.mrf.mxu0  ;;  %v2071_v21 = vsel %vm455_vm1, %v2061_v11, 0 }
 0x1a8   : > { %1927 = vmatpush.bf16.msrb.mxu1 %v1899_v32  ;;  %v1099_v40 = vadd.f32 %v1056_v37, %v1013_v16 }
 0x1a9   : > { %v2140_v10 = vpop.permute.xlu2 %2139 }
 0x1aa   : > { %v998_v35 = vpop.f32.mrf.mxu2  ;;  %v1011_v0 = vpop.f32.mrf.mxu3  ;;  %3096 = vmatmul.msk.bf16.vlgmr.msrb.gmra.mxu0 %vm451_vm2, %v424_v30 }
 0x1ab   : > { %1914 = vmatpush.bf16.msrb.mxu0 %v1896_v41  ;;  %v2050_v4 = vpop.permute.xlu0 %2049 }
 0x1ac   : > { %v1071_v43 = vpop.f32.mrf.mxu1  ;;  %v2060_v23 = vsel %vm2059_vm5, %v2050_v4, %v2052_v7 }
 0x1ad   : > { %v2144_v22 = vpop.permute.xlu1 %2143  ;;  %v427_v43 = vld [vmem:[%s4371_s0 + $0x48] sm:$0xf] }
 0x1af   : > { %3098 = vmatmul.msk.bf16.vlgmr.msrb.gmra.mxu2 %vm451_vm2, %v424_v30  ;;  %3099 = vmatmul.msk.bf16.vlgmr.msrb.gmra.mxu3 %vm451_vm2, %v424_v30  ;;  %v1058_v46 = vpop.f32.mrf.mxu0  ;;  %v2068_v30 = vsel %vm455_vm1, %v2060_v23, 0 }
 0x1b0   : > { %1940 = vmatpush.bf16.msrb.mxu2 %v1902_v44  ;;  %1953 = vmatpush.bf16.msrb.mxu3 %v1905_v45 }
 0x1b2   : > { %v1082_v47 = vpop.f32.mrf.mxu2  ;;  %v1095_v50 = vpop.f32.mrf.mxu3 }
 0x1b3   : > { %v1101_v49 = vadd.f32 %v1082_v47, %v1015_v26  ;;  %v1102_v52 = vadd.f32 %v1095_v50, %v1016_v28  ;;  %v2142_v9 = vpop.permute.xlu0 %2141  ;;  %v2062_v26 = vsel %vm2059_vm5, %v2054_v51, %v2056_v57 }
 0x1b4   : > { %v1155_v53 = vpop.f32.mrf.mxu1  ;;  %v2074_v33 = vsel %vm455_vm1, %v2062_v26, 0  ;;  %v2148_v50 = vsel %vm2145_vm6, %v2140_v10, %v2142_v9  ;;  %v2149_v51 = vsel %vm2145_vm6, %v2142_v9, %v2144_v22 }
 0x1b5   : > { %v1186_v55 = vadd.f32 %v1155_v53, %v1100_v31  ;;  %v2136_v31 = vpop.permute.xlu2 %2135  ;;  %v2226_v35 = vpop.permute.xlu1 %2225  ;;  %v2160_v57 = vsel %vm455_vm1, %v2148_v50, 0  ;;  %v2163_v58 = vsel %vm455_vm1, %v2149_v51, 0 }
 0x1b7   : > { %3101 = vmatmul.msk.bf16.vlgmr.msra.gmra.mxu1 %vm451_vm2, %v425_v54  ;;  %v1142_v36 = vpop.f32.mrf.mxu0 }
 0x1b8   : > { %2013 = vmatpush.bf16.msra.mxu1 %v1985_v56  ;;  %v1185_v1 = vadd.f32 %v1142_v36, %v1099_v40 }
 0x1ba   : > { %v1084_v60 = vpop.f32.mrf.mxu2  ;;  %v1097_v63 = vpop.f32.mrf.mxu3  ;;  %3100 = vmatmul.msk.bf16.vlgmr.msra.gmra.mxu0 %vm451_vm2, %v425_v54 }
 0x1bb   : > { %2000 = vmatpush.bf16.msra.mxu0 %v1982_v3  ;;  %v2138_v34 = vpop.permute.xlu0 %2137 }
 0x1bc   : > { %v1157_v5 = vpop.f32.mrf.mxu1  ;;  %v2147_v39 = vsel %vm2145_vm6, %v2138_v34, %v2140_v10  ;;  %v2146_v47 = vsel %vm2145_vm6, %v2136_v31, %v2138_v34 }
 0x1bd   : > { %v2157_v45 = vsel %vm455_vm1, %v2147_v39, 0  ;;  %v2228_v8 = vpop.permute.xlu2 %2227  ;;  %v428_v5 = vld [vmem:[%s4371_s0 + $0x4c] sm:$0xf] }
 0x1bf   : > { %3102 = vmatmul.msk.bf16.vlgmr.msra.gmra.mxu2 %vm451_vm2, %v425_v54  ;;  %3103 = vmatmul.msk.bf16.vlgmr.msra.gmra.mxu3 %vm451_vm2, %v425_v54  ;;  %v1144_v13 = vpop.f32.mrf.mxu0  ;;  %v2154_v54 = vsel %vm455_vm1, %v2146_v47, 0 }
 0x1c0   : > { %2026 = vmatpush.bf16.msra.mxu2 %v1988_v6  ;;  %2039 = vmatpush.bf16.msra.mxu3 %v1991_v12 }
 0x1c2   : > { %v1168_v14 = vpop.f32.mrf.mxu2  ;;  %v1181_v16 = vpop.f32.mrf.mxu3 }
 0x1c3   : > { %v1187_v15 = vadd.f32 %v1168_v14, %v1101_v49  ;;  %v1188_v17 = vadd.f32 %v1181_v16, %v1102_v52  ;;  %v2230_v46 = vpop.permute.xlu0 %2229 }
 0x1c4   : > { %v1241_v18 = vpop.f32.mrf.mxu1  ;;  %v2235_v16 = vsel %vm2231_vm7, %v2228_v8, %v2230_v46 }
 0x1c5   : > { %v1272_v20 = vadd.f32 %v1241_v18, %v1186_v55  ;;  %v2222_v55 = vpop.permute.xlu1 %2221  ;;  %v2224_v59 = vpop.permute.xlu2 %2223  ;;  %v2249_v22 = vsel %vm455_vm1, %v2235_v16, 0 }
 0x1c6   : > { %v2233_v62 = vsel %vm2231_vm7, %v2224_v59, %v2226_v35  ;;  %v2232_v13 = vsel %vm2231_vm7, %v2222_v55, %v2224_v59 }
 0x1c7   : > { %3105 = vmatmul.msk.bf16.vlgmr.msrb.gmra.mxu1 %vm451_vm2, %v426_v19  ;;  %v1228_v25 = vpop.f32.mrf.mxu0  ;;  %v2243_v12 = vsel %vm455_vm1, %v2233_v62, 0 }
 0x1c8   : > { %2099 = vmatpush.bf16.msrb.mxu1 %v2071_v21  ;;  %v1271_v29 = vadd.f32 %v1228_v25, %v1185_v1 }
 0x1ca   : > { %v1170_v24 = vpop.f32.mrf.mxu2  ;;  %v1183_v28 = vpop.f32.mrf.mxu3  ;;  %3104 = vmatmul.msk.bf16.vlgmr.msrb.gmra.mxu0 %vm451_vm2, %v426_v19 }
 0x1cb   : > { %2086 = vmatpush.bf16.msrb.mxu0 %v2068_v30  ;;  %v2312_v60 = vpop.permute.xlu0 %2311 }
 0x1cc   : > { %v1243_v32 = vpop.f32.mrf.mxu1 }
 0x1cd   : > { %v2314_v7 = vpop.permute.xlu1 %2313  ;;  %v2316_v10 = vpop.permute.xlu2 %2315  ;;  %v429_v32 = vld [vmem:[%s4371_s0 + $0x50] sm:$0xf] }
 0x1cf   : > { %3106 = vmatmul.msk.bf16.vlgmr.msrb.gmra.mxu2 %vm451_vm2, %v426_v19  ;;  %3107 = vmatmul.msk.bf16.vlgmr.msrb.gmra.mxu3 %vm451_vm2, %v426_v19  ;;  %v1230_v37 = vpop.f32.mrf.mxu0  ;;  %v2240_v19 = vsel %vm455_vm1, %v2232_v13, 0 }
 0x1d0   : > { %2112 = vmatpush.bf16.msrb.mxu2 %v2074_v33  ;;  %2125 = vmatpush.bf16.msrb.mxu3 %v2077_v2 }
 0x1d2   : > { %v1254_v38 = vpop.f32.mrf.mxu2  ;;  %v1267_v40 = vpop.f32.mrf.mxu3 }
 0x1d3   : > { %v1273_v0 = vadd.f32 %v1254_v38, %v1187_v15  ;;  %v1274_v41 = vadd.f32 %v1267_v40, %v1188_v17  ;;  %v2234_v15 = vsel %vm2231_vm7, %v2226_v35, %v2228_v8  ;;  %v2321_v40 = vsel %vm2317_vm8, %v2314_v7, %v2316_v10 }
 0x1d4   : > { %v1327_v42 = vpop.f32.mrf.mxu1  ;;  %v2246_v9 = vsel %vm455_vm1, %v2234_v15, 0  ;;  %v2335_v46 = vsel %vm455_vm1, %v2321_v40, 0 }
 0x1d5   : > { %v1358_v44 = vadd.f32 %v1327_v42, %v1272_v20  ;;  %v2308_v20 = vpop.permute.xlu0 %2307  ;;  %v2310_v23 = vpop.permute.xlu1 %2309 }
 0x1d6   : > { %v2398_v24 = vpop.permute.xlu2 %2397  ;;  %v2319_v27 = vsel %vm2317_vm8, %v2310_v23, %v2312_v60  ;;  %v2318_v35 = vsel %vm2317_vm8, %v2308_v20, %v2310_v23 }
 0x1d7   : > { %3109 = vmatmul.msk.bf16.vlgmr.msra.gmra.mxu1 %vm451_vm2, %v427_v43  ;;  %v1314_v49 = vpop.f32.mrf.mxu0  ;;  %v2329_v2 = vsel %vm455_vm1, %v2319_v27, 0 }
 0x1d8   : > { %2185 = vmatpush.bf16.msra.mxu1 %v2157_v45  ;;  %v1357_v53 = vadd.f32 %v1314_v49, %v1271_v29 }
 0x1da   : > { %v1256_v48 = vpop.f32.mrf.mxu2  ;;  %v1269_v52 = vpop.f32.mrf.mxu3  ;;  %3108 = vmatmul.msk.bf16.vlgmr.msra.gmra.mxu0 %vm451_vm2, %v427_v43 }
 0x1db   : > { %2172 = vmatpush.bf16.msra.mxu0 %v2154_v54 }
 0x1dc   : > { %v1329_v56 = vpop.f32.mrf.mxu1 }
 0x1dd   : > { %v2400_v34 = vpop.permute.xlu0 %2399  ;;  %v2402_v37 = vpop.permute.xlu1 %2401  ;;  %v430_v56 = vld [vmem:[%s4371_s0 + $0x54] sm:$0xf] }
 0x1df   : > { %3110 = vmatmul.msk.bf16.vlgmr.msra.gmra.mxu2 %vm451_vm2, %v427_v43  ;;  %3111 = vmatmul.msk.bf16.vlgmr.msra.gmra.mxu3 %vm451_vm2, %v427_v43  ;;  %v1316_v36 = vpop.f32.mrf.mxu0  ;;  %v2326_v43 = vsel %vm455_vm1, %v2318_v35, 0 }
 0x1e0   : > { %2198 = vmatpush.bf16.msra.mxu2 %v2160_v57  ;;  %2211 = vmatpush.bf16.msra.mxu3 %v2163_v58 }
 0x1e2   : > { %v1340_v61 = vpop.f32.mrf.mxu2  ;;  %v1353_v1 = vpop.f32.mrf.mxu3 }
 0x1e3   : > { %v1359_v63 = vadd.f32 %v1340_v61, %v1273_v0  ;;  %v1360_v3 = vadd.f32 %v1353_v1, %v1274_v41  ;;  %v2320_v0 = vsel %vm2317_vm8, %v2312_v60, %v2314_v7  ;;  %v2407_v1 = vsel %vm2403_vm9, %v2400_v34, %v2402_v37 }
 0x1e4   : > { %v1413_v4 = vpop.f32.mrf.mxu1  ;;  %v2332_v8 = vsel %vm455_vm1, %v2320_v0, 0  ;;  %v2421_v10 = vsel %vm455_vm1, %v2407_v1, 0 }
 0x1e5   : > { %v1444_v6 = vadd.f32 %v1413_v4, %v1358_v44  ;;  %v2394_v44 = vpop.permute.xlu2 %2393  ;;  %v2396_v47 = vpop.permute.xlu0 %2395 }
 0x1e6   : > { %v2484_v48 = vpop.permute.xlu1 %2483  ;;  %v2405_v51 = vsel %vm2403_vm9, %v2396_v47, %v2398_v24  ;;  %v2404_v36 = vsel %vm2403_vm9, %v2394_v44, %v2396_v47  ;;  %v432_v44 = vld [vmem:[%s4371_s0 + $0x5c] sm:$0xf] }
 0x1e7   : > { %3113 = vmatmul.msk.bf16.vlgmr.msrb.gmra.mxu1 %vm451_vm2, %v428_v5  ;;  %v1400_v11 = vpop.f32.mrf.mxu0  ;;  %v2415_v58 = vsel %vm455_vm1, %v2405_v51, 0 }
 0x1e8   : > { %2271 = vmatpush.bf16.msrb.mxu1 %v2243_v12  ;;  %v1443_v18 = vadd.f32 %v1400_v11, %v1357_v53 }
 0x1ea   : > { %v1342_v14 = vpop.f32.mrf.mxu2  ;;  %v1355_v17 = vpop.f32.mrf.mxu3  ;;  %3112 = vmatmul.msk.bf16.vlgmr.msrb.gmra.mxu0 %vm451_vm2, %v428_v5 }
 0x1eb   : > { %2258 = vmatpush.bf16.msrb.mxu0 %v2240_v19 }
 0x1ec   : > { %v1415_v21 = vpop.f32.mrf.mxu1 }
 0x1ed   : > { %v2486_v59 = vpop.permute.xlu2 %2485  ;;  %v2488_v60 = vpop.permute.xlu0 %2487  ;;  %v431_v21 = vld [vmem:[%s4371_s0 + $0x58] sm:$0xf] }
 0x1ee   : > { %v2492_v27 = vsel %vm2489_vm10, %v2484_v48, %v2486_v59 }
 0x1ef   : > { %3114 = vmatmul.msk.bf16.vlgmr.msrb.gmra.mxu2 %vm451_vm2, %v428_v5  ;;  %3115 = vmatmul.msk.bf16.vlgmr.msrb.gmra.mxu3 %vm451_vm2, %v428_v5  ;;  %v1402_v25 = vpop.f32.mrf.mxu0  ;;  %v2412_v5 = vsel %vm455_vm1, %v2404_v36, 0 }
 0x1f0   : > { %2284 = vmatpush.bf16.msrb.mxu2 %v2246_v9  ;;  %2297 = vmatpush.bf16.msrb.mxu3 %v2249_v22 }
 0x1f2   : > { %v1426_v26 = vpop.f32.mrf.mxu2  ;;  %v1439_v29 = vpop.f32.mrf.mxu3 }
 0x1f3   : > { %v1445_v28 = vadd.f32 %v1426_v26, %v1359_v63  ;;  %v1446_v30 = vadd.f32 %v1439_v29, %v1360_v3  ;;  %v2406_v63 = vsel %vm2403_vm9, %v2398_v24, %v2400_v34 }
 0x1f4   : > { %v1499_v31 = vpop.f32.mrf.mxu1  ;;  %v2418_v7 = vsel %vm455_vm1, %v2406_v63, 0 }
 0x1f5   : > { %v1530_v33 = vadd.f32 %v1499_v31, %v1444_v6  ;;  %v2480_v6 = vpop.permute.xlu1 %2479  ;;  %v2482_v13 = vpop.permute.xlu2 %2481 }
 0x1f6   : > { %v2570_v14 = vpop.permute.xlu0 %2569  ;;  %v2491_v16 = vsel %vm2489_vm10, %v2482_v13, %v2484_v48  ;;  %v2490_v24 = vsel %vm2489_vm10, %v2480_v6, %v2482_v13 }
 0x1f7   : > { %3117 = vmatmul.msk.bf16.vlgmr.msra.gmra.mxu1 %vm451_vm2, %v429_v32  ;;  %v1486_v39 = vpop.f32.mrf.mxu0  ;;  %v2501_v22 = vsel %vm455_vm1, %v2491_v16, 0  ;;  %v2498_v31 = vsel %vm455_vm1, %v2490_v24, 0 }
 0x1f8   : > { %2357 = vmatpush.bf16.msra.mxu1 %v2329_v2  ;;  %v1529_v42 = vadd.f32 %v1486_v39, %v1443_v18  ;;  %v2504_v2 = vsel %vm455_vm1, %v2492_v27, 0  ;;  %v434_v27 = vld [vmem:[%s4371_s0 + $0x64] sm:$0xf] }
 0x1fa   : > { %v1428_v38 = vpop.f32.mrf.mxu2  ;;  %v1441_v41 = vpop.f32.mrf.mxu3  ;;  %3116 = vmatmul.msk.bf16.vlgmr.msra.gmra.mxu0 %vm451_vm2, %v429_v32 }
 0x1fb   : > { %2344 = vmatpush.bf16.msra.mxu0 %v2326_v43 }
 0x1fc   : > { %v1501_v45 = vpop.f32.mrf.mxu1 }
 0x1fd   : > { %v2572_v23 = vpop.permute.xlu1 %2571  ;;  %v2574_v41 = vpop.permute.xlu2 %2573 }
 0x1fe   : > { %v2579_v51 = vsel %vm2575_vm11, %v2572_v23, %v2574_v41 }
 0x1ff   : > { %3118 = vmatmul.msk.bf16.vlgmr.msra.gmra.mxu2 %vm451_vm2, %v429_v32  ;;  %3119 = vmatmul.msk.bf16.vlgmr.msra.gmra.mxu3 %vm451_vm2, %v429_v32  ;;  %v1488_v49 = vpop.f32.mrf.mxu0  ;;  %v2566_v32 = vpop.permute.xlu0 %2565 }
 0x200   : > { %2370 = vmatpush.bf16.msra.mxu2 %v2332_v8  ;;  %2383 = vmatpush.bf16.msra.mxu3 %v2335_v46 }
 0x202   : > { %v1512_v50 = vpop.f32.mrf.mxu2  ;;  %v1525_v53 = vpop.f32.mrf.mxu3 }
 0x203   : > { %v1531_v52 = vadd.f32 %v1512_v50, %v1445_v28  ;;  %v1532_v54 = vadd.f32 %v1525_v53, %v1446_v30  ;;  %v2493_v28 = vsel %vm2489_vm10, %v2486_v59, %v2488_v60  ;;  %v2578_v50 = vsel %vm2575_vm11, %v2570_v14, %v2572_v23 }
 0x204   : > { %v1585_v55 = vpop.f32.mrf.mxu1  ;;  %v2507_v34 = vsel %vm455_vm1, %v2493_v28, 0 }
 0x205   : > { %v1616_v57 = vadd.f32 %v1585_v55, %v1530_v33  ;;  %v2568_v35 = vpop.permute.xlu1 %2567  ;;  %v2656_v55 = vpop.permute.xlu2 %2655 }
 0x206   : > { %v2577_v39 = vsel %vm2575_vm11, %v2568_v35, %v2570_v14  ;;  %v2576_v47 = vsel %vm2575_vm11, %v2566_v32, %v2568_v35 }
 0x207   : > { %3121 = vmatmul.msk.bf16.vlgmr.msrb.gmra.mxu1 %vm451_vm2, %v430_v56  ;;  %v1572_v62 = vpop.f32.mrf.mxu0  ;;  %v2587_v8 = vsel %vm455_vm1, %v2577_v39, 0  ;;  %v2658_v46 = vpop.permute.xlu0 %2657 }
 0x208   : > { %2443 = vmatpush.bf16.msrb.mxu1 %v2415_v58  ;;  %v1615_v4 = vadd.f32 %v1572_v62, %v1529_v42  ;;  %v2593_v58 = vsel %vm455_vm1, %v2579_v51, 0 }
 0x20a   : > { %v1514_v61 = vpop.f32.mrf.mxu2  ;;  %v1527_v3 = vpop.f32.mrf.mxu3  ;;  %3120 = vmatmul.msk.bf16.vlgmr.msrb.gmra.mxu0 %vm451_vm2, %v430_v56 }
 0x20b   : > { %2430 = vmatpush.bf16.msrb.mxu0 %v2412_v5 }
 0x20c   : > { %v1587_v12 = vpop.f32.mrf.mxu1 }
 0x20d   : > { %v2652_v12 = vpop.permute.xlu2 %2651 }
 0x20f   : > { %3122 = vmatmul.msk.bf16.vlgmr.msrb.gmra.mxu2 %vm451_vm2, %v430_v56  ;;  %3123 = vmatmul.msk.bf16.vlgmr.msrb.gmra.mxu3 %vm451_vm2, %v430_v56  ;;  %v1574_v11 = vpop.f32.mrf.mxu0  ;;  %v2654_v59 = vpop.permute.xlu0 %2653 }
 0x210   : > { %2456 = vmatpush.bf16.msrb.mxu2 %v2418_v7  ;;  %2469 = vmatpush.bf16.msrb.mxu3 %v2421_v10  ;;  %v2663_v61 = vsel %vm2661_vm12, %v2654_v59, %v2656_v55  ;;  %v2660_v7 = vpop.permute.xlu1 %2659  ;;  %v2662_v10 = vsel %vm2661_vm12, %v2652_v12, %v2654_v59  ;;  %v2664_v11 = vsel %vm2661_vm12, %v2656_v55, %v2658_v46 }
 0x211   : > { %v2673_v6 = vsel %vm455_vm1, %v2663_v61, 0 }
 0x212   : > { %v1598_v15 = vpop.f32.mrf.mxu2  ;;  %v1611_v18 = vpop.f32.mrf.mxu3 }
 0x213   : > { %v1617_v17 = vadd.f32 %v1598_v15, %v1531_v52  ;;  %v1618_v19 = vadd.f32 %v1611_v18, %v1532_v54  ;;  %v2584_v54 = vsel %vm455_vm1, %v2576_v47, 0  ;;  %v2665_v15 = vsel %vm2661_vm12, %v2658_v46, %v2660_v7 }
 0x214   : > { %v1671_v20 = vpop.f32.mrf.mxu1  ;;  %v2670_v18 = vsel %vm455_vm1, %v2662_v10, 0 }
 0x215   : > { %v1702_v9 = vadd.f32 %v1671_v20, %v1616_v57  ;;  %v2590_v57 = vsel %vm455_vm1, %v2578_v50, 0  ;;  %v2676_v20 = vsel %vm455_vm1, %v2664_v11, 0 }
 0x217   : > { %3125 = vmatmul.msk.bf16.vlgmr.msra.gmra.mxu1 %vm451_vm2, %v431_v21  ;;  %v1658_v26 = vpop.f32.mrf.mxu0 }
 0x218   : > { %2529 = vmatpush.bf16.msra.mxu1 %v2501_v22  ;;  %v1701_v30 = vadd.f32 %v1658_v26, %v1615_v4  ;;  %v433_v4 = vld [vmem:[%s4371_s0 + $0x60] sm:$0xf] }
 0x21a   : > { %v1600_v25 = vpop.f32.mrf.mxu2  ;;  %v1613_v29 = vpop.f32.mrf.mxu3  ;;  %3124 = vmatmul.msk.bf16.vlgmr.msra.gmra.mxu0 %vm451_vm2, %v431_v21 }
 0x21b   : > { %2516 = vmatpush.bf16.msra.mxu0 %v2498_v31 }
 0x21c   : > { %v1673_v33 = vpop.f32.mrf.mxu1 }
 0x21f   : > { %3126 = vmatmul.msk.bf16.vlgmr.msra.gmra.mxu2 %vm451_vm2, %v431_v21  ;;  %3127 = vmatmul.msk.bf16.vlgmr.msra.gmra.mxu3 %vm451_vm2, %v431_v21  ;;  %v1660_v37 = vpop.f32.mrf.mxu0  ;;  %v2679_v21 = vsel %vm455_vm1, %v2665_v15, 0  ;;  %vm2755_vm1 = vcmask 1040384  }
 0x220   : > { %2542 = vmatpush.bf16.msra.mxu2 %v2504_v2  ;;  %2555 = vmatpush.bf16.msra.mxu3 %v2507_v34 }
 0x222   : > { %v1684_v38 = vpop.f32.mrf.mxu2  ;;  %v1697_v40 = vpop.f32.mrf.mxu3 }
 0x223   : > { %v1703_v0 = vadd.f32 %v1684_v38, %v1617_v17  ;;  %v1704_v42 = vadd.f32 %v1697_v40, %v1618_v19 }
 0x224   : > { %v1757_v43 = vpop.f32.mrf.mxu1 }
 0x225   : > { %v1788_v45 = vadd.f32 %v1757_v43, %v1702_v9 }
 0x227   : > { %3129 = vmatmul.msk.bf16.vlgmr.msrb.gmra.mxu1 %vm451_vm2, %v432_v44  ;;  %v1744_v49 = vpop.f32.mrf.mxu0 }
 0x228   : > { %2615 = vmatpush.bf16.msrb.mxu1 %v2587_v8  ;;  %v1787_v53 = vadd.f32 %v1744_v49, %v1701_v30 }
 0x22a   : > { %v1686_v48 = vpop.f32.mrf.mxu2  ;;  %v1699_v52 = vpop.f32.mrf.mxu3  ;;  %3128 = vmatmul.msk.bf16.vlgmr.msrb.gmra.mxu0 %vm451_vm2, %v432_v44 }
 0x22b   : > { %2602 = vmatpush.bf16.msrb.mxu0 %v2584_v54 }
 0x22c   : > { %v1759_v56 = vpop.f32.mrf.mxu1 }
 0x22f   : > { %3130 = vmatmul.msk.bf16.vlgmr.msrb.gmra.mxu2 %vm451_vm2, %v432_v44  ;;  %3131 = vmatmul.msk.bf16.vlgmr.msrb.gmra.mxu3 %vm451_vm2, %v432_v44  ;;  %v1746_v60 = vpop.f32.mrf.mxu0 }
 0x230   : > { %2628 = vmatpush.bf16.msrb.mxu2 %v2590_v57  ;;  %2641 = vmatpush.bf16.msrb.mxu3 %v2593_v58 }
 0x232   : > { %v1770_v36 = vpop.f32.mrf.mxu2  ;;  %v1783_v63 = vpop.f32.mrf.mxu3 }
 0x233   : > { %v1789_v62 = vadd.f32 %v1770_v36, %v1703_v0  ;;  %v1790_v1 = vadd.f32 %v1783_v63, %v1704_v42  ;;  %v435_v0 = vld [vmem:[%s4371_s0 + $0x68] sm:$0xf] }
 0x234   : > { %v1843_v3 = vpop.f32.mrf.mxu1 }
 0x235   : > { %v1874_v5 = vadd.f32 %v1843_v3, %v1788_v45 }
 0x237   : > { %3133 = vmatmul.msk.bf16.vlgmr.msra.gmra.mxu1 %vm451_vm2, %v433_v4  ;;  %v1830_v14 = vpop.f32.mrf.mxu0 }
 0x238   : > { %2701 = vmatpush.bf16.msra.mxu1 %v2673_v6  ;;  %v1873_v17 = vadd.f32 %v1830_v14, %v1787_v53 }
 0x23a   : > { %v1772_v13 = vpop.f32.mrf.mxu2  ;;  %v1785_v16 = vpop.f32.mrf.mxu3  ;;  %3132 = vmatmul.msk.bf16.vlgmr.msra.gmra.mxu0 %vm451_vm2, %v433_v4 }
 0x23b   : > { %2688 = vmatpush.bf16.msra.mxu0 %v2670_v18 }
 0x23c   : > { %v1845_v19 = vpop.f32.mrf.mxu1 }
 0x23f   : > { %3134 = vmatmul.msk.bf16.vlgmr.msra.gmra.mxu2 %vm451_vm2, %v433_v4  ;;  %3135 = vmatmul.msk.bf16.vlgmr.msra.gmra.mxu3 %vm451_vm2, %v433_v4  ;;  %v1832_v9 = vpop.f32.mrf.mxu0 }
 0x240   : > { %2714 = vmatpush.bf16.msra.mxu2 %v2676_v20  ;;  %2727 = vmatpush.bf16.msra.mxu3 %v2679_v21 }
 0x242   : > { %v1856_v22 = vpop.f32.mrf.mxu2  ;;  %v1869_v24 = vpop.f32.mrf.mxu3 }
 0x243   : > { %v1875_v23 = vadd.f32 %v1856_v22, %v1789_v62  ;;  %v1876_v25 = vadd.f32 %v1869_v24, %v1790_v1 }
 0x244   : > { %v1929_v26 = vpop.f32.mrf.mxu1 }
 0x245   : > { %v1960_v28 = vadd.f32 %v1929_v26, %v1874_v5 }
 0x247   : > { %3137 = vmatmul.msk.bf16.vlgmr.msrb.gmra.mxu1 %vm451_vm2, %v434_v27  ;;  %v1916_v30 = vpop.f32.mrf.mxu0 }
 0x248   : > { %v1959_v32 = vadd.f32 %v1916_v30, %v1873_v17 }
 0x24a   : > { %v1858_v29 = vpop.f32.mrf.mxu2  ;;  %v1871_v31 = vpop.f32.mrf.mxu3  ;;  %3136 = vmatmul.msk.bf16.vlgmr.msrb.gmra.mxu0 %vm451_vm2, %v434_v27 }
 0x24b   : > { %v2737_v29 = vld [vmem:[%s371_s13] sm:$0xf]  ;;  %s2835_s13 = sshll.u32 %s4287_s16, 4  ;;  %s2836_s13 = int_to_ptr.vmem [resolvable:$true] %s2835_s13 }
 0x24c   : > { %v1931_v33 = vpop.f32.mrf.mxu1  ;;  %v4262_v30 = vperm.slane %v2737_v29, 0  ;;  %v4264_v31 = vperm.slane %v2737_v29, 1 }
 0x24f   : > { %3138 = vmatmul.msk.bf16.vlgmr.msrb.gmra.mxu2 %vm451_vm2, %v434_v27  ;;  %3139 = vmatmul.msk.bf16.vlgmr.msrb.gmra.mxu3 %vm451_vm2, %v434_v27  ;;  %v1918_v2 = vpop.f32.mrf.mxu0 }
 0x252   : > { %v1942_v34 = vpop.f32.mrf.mxu2  ;;  %v1955_v37 = vpop.f32.mrf.mxu3 }
 0x253   : > { %v1961_v35 = vadd.f32 %v1942_v34, %v1875_v23  ;;  %v1962_v38 = vadd.f32 %v1955_v37, %v1876_v25  ;;  %v4266_v34 = vperm.slane %v2737_v29, 2  ;;  %v2757_v37 = vsel %vm2755_vm1, %v4264_v31, 0.0 }
 0x254   : > { %v2015_v39 = vpop.f32.mrf.mxu1 }
 0x255   : > { %v2046_v40 = vadd.f32 %v2015_v39, %v1960_v28 }
 0x257   : > { %3141 = vmatmul.msk.bf16.vlgmr.msra.gmra.mxu1 %vm451_vm2, %v435_v0  ;;  %v2002_v42 = vpop.f32.mrf.mxu0 }
 0x258   : > { %v2045_v44 = vadd.f32 %v2002_v42, %v1959_v32 }
 0x25a   : > { %v1944_v41 = vpop.f32.mrf.mxu2  ;;  %v1957_v43 = vpop.f32.mrf.mxu3  ;;  %3140 = vmatmul.msk.bf16.vlgmr.msra.gmra.mxu0 %vm451_vm2, %v435_v0 }
 0x25c   : > { %v2017_v45 = vpop.f32.mrf.mxu1 }
 0x25f   : > { %3142 = vmatmul.msk.bf16.vlgmr.msra.gmra.mxu2 %vm451_vm2, %v435_v0  ;;  %3143 = vmatmul.msk.bf16.vlgmr.msra.gmra.mxu3 %vm451_vm2, %v435_v0  ;;  %v2004_v8 = vpop.f32.mrf.mxu0  ;;  %v4270_v0 = vperm.slane %v2737_v29, 3 }
 0x261   : > { %v2761_v42 = vsel %vm2755_vm1, %v4270_v0, 0.0 }
 0x262   : > { %v2028_v46 = vpop.f32.mrf.mxu2  ;;  %v2041_v48 = vpop.f32.mrf.mxu3 }
 0x263   : > { %v2047_v47 = vadd.f32 %v2028_v46, %v1961_v35  ;;  %v2048_v49 = vadd.f32 %v2041_v48, %v1962_v38  ;;  %v2756_v35 = vsel %vm2755_vm1, %v4262_v30, 0.0 }
 0x264   : > { %v2101_v50 = vpop.f32.mrf.mxu1  ;;  %v2758_v39 = vadd.f32 %v2757_v37, %v2756_v35 }
 0x265   : > { %v2132_v51 = vadd.f32 %v2101_v50, %v2046_v40  ;;  %v2759_v40 = vsel %vm2755_vm1, %v4266_v34, 0.0 }
 0x266   : > { %v2760_v41 = vadd.f32 %v2759_v40, %v2758_v39 }
 0x267   : > { %v2088_v53 = vpop.f32.mrf.mxu0 }
 0x268   : > { %v2131_v55 = vadd.f32 %v2088_v53, %v2045_v44  ;;  %v2762_v43 = vadd.f32 %v2761_v42, %v2760_v41 }
 0x26a   : > { %v2030_v52 = vpop.f32.mrf.mxu2  ;;  %v2043_v54 = vpop.f32.mrf.mxu3  ;;  %2763 = vadd.xlane.f32.xlu1 %v2762_v43 }
 0x26c   : > { %v2103_v56 = vpop.f32.mrf.mxu1 }
 0x26f   : > { %v2090_v57 = vpop.f32.mrf.mxu0 }
 0x272   : > { %v2114_v58 = vpop.f32.mrf.mxu2  ;;  %v2127_v60 = vpop.f32.mrf.mxu3 }
 0x273   : > { %v2133_v59 = vadd.f32 %v2114_v58, %v2047_v47  ;;  %v2134_v36 = vadd.f32 %v2127_v60, %v2048_v49 }
 0x274   : > { %v2187_v61 = vpop.f32.mrf.mxu1 }
 0x275   : > { %v2218_v62 = vadd.f32 %v2187_v61, %v2132_v51 }
 0x277   : > { %v2174_v1 = vpop.f32.mrf.mxu0 }
 0x278   : > { %v2217_v4 = vadd.f32 %v2174_v1, %v2131_v55 }
 0x27a   : > { %v2116_v63 = vpop.f32.mrf.mxu2  ;;  %v2129_v3 = vpop.f32.mrf.mxu3 }
 0x27c   : > { %v2189_v5 = vpop.f32.mrf.mxu1 }
 0x27f   : > { %v2176_v6 = vpop.f32.mrf.mxu0 }
 0x282   : > { %v2200_v12 = vpop.f32.mrf.mxu2  ;;  %v2213_v10 = vpop.f32.mrf.mxu3 }
 0x283   : > { %v2219_v7 = vadd.f32 %v2200_v12, %v2133_v59  ;;  %v2220_v13 = vadd.f32 %v2213_v10, %v2134_v36 }
 0x284   : > { %v2273_v14 = vpop.f32.mrf.mxu1 }
 0x285   : > { %v2304_v11 = vadd.f32 %v2273_v14, %v2218_v62 }
 0x287   : > { %v2260_v16 = vpop.f32.mrf.mxu0 }
 0x288   : > { %v2303_v18 = vadd.f32 %v2260_v16, %v2217_v4 }
 0x28a   : > { %v2202_v15 = vpop.f32.mrf.mxu2  ;;  %v2215_v17 = vpop.f32.mrf.mxu3 }
 0x28c   : > { %v2275_v19 = vpop.f32.mrf.mxu1 }
 0x28f   : > { %v2262_v20 = vpop.f32.mrf.mxu0 }
 0x292   : > { %v2286_v21 = vpop.f32.mrf.mxu2  ;;  %v2299_v22 = vpop.f32.mrf.mxu3 }
 0x293   : > { %v4253_v9 = vadd.f32 %v2286_v21, %v2219_v7  ;;  %v4255_v23 = vadd.f32 %v2299_v22, %v2220_v13 }
 0x294   : > { %v2359_v24 = vpop.f32.mrf.mxu1 }
 0x295   : > { %v2390_v62 = vadd.f32 %v2359_v24, %v2304_v11 }
 0x297   : > { %v2346_v26 = vpop.f32.mrf.mxu0 }
 0x298   : > { %v2389_v3 = vadd.f32 %v2346_v26, %v2303_v18 }
 0x29a   : > { %v2288_v25 = vpop.f32.mrf.mxu2  ;;  %v2301_v27 = vpop.f32.mrf.mxu3 }
 0x29c   : > { %v2361_v28 = vpop.f32.mrf.mxu1 }
 0x29f   : > { %v2348_v32 = vpop.f32.mrf.mxu0 }
 0x2a2   : > { %v2372_v33 = vpop.f32.mrf.mxu2  ;;  %v2385_v2 = vpop.f32.mrf.mxu3 }
 0x2a3   : > { %v2391_v19 = vadd.f32 %v2372_v33, %v4253_v9  ;;  %v2392_v18 = vadd.f32 %v2385_v2, %v4255_v23 }
 0x2a4   : > { %v2445_v38 = vpop.f32.mrf.mxu1 }
 0x2a5   : > { %v2476_v4 = vadd.f32 %v2445_v38, %v2390_v62 }
 0x2a7   : > { %v2432_v45 = vpop.f32.mrf.mxu0 }
 0x2a8   : > { %v2475_v12 = vadd.f32 %v2432_v45, %v2389_v3 }
 0x2aa   : > { %v2374_v44 = vpop.f32.mrf.mxu2  ;;  %v2387_v8 = vpop.f32.mrf.mxu3 }
 0x2ac   : > { %v2447_v46 = vpop.f32.mrf.mxu1 }
 0x2af   : > { %v2434_v47 = vpop.f32.mrf.mxu0 }
 0x2b2   : > { %v2458_v48 = vpop.f32.mrf.mxu2  ;;  %v2471_v49 = vpop.f32.mrf.mxu3 }
 0x2b3   : > { %v2477_v22 = vadd.f32 %v2458_v48, %v2391_v19  ;;  %v2478_v26 = vadd.f32 %v2471_v49, %v2392_v18 }
 0x2b4   : > { %v2531_v50 = vpop.f32.mrf.mxu1 }
 0x2b5   : > { %v2562_v7 = vadd.f32 %v2531_v50, %v2476_v4 }
 0x2b7   : > { %v2518_v52 = vpop.f32.mrf.mxu0 }
 0x2b8   : > { %v2561_v10 = vadd.f32 %v2518_v52, %v2475_v12 }
 0x2ba   : > { %v2460_v51 = vpop.f32.mrf.mxu2  ;;  %v2473_v53 = vpop.f32.mrf.mxu3 }
 0x2bc   : > { %v2533_v54 = vpop.f32.mrf.mxu1 }
 0x2bf   : > { %v2520_v55 = vpop.f32.mrf.mxu0 }
 0x2c2   : > { %v2544_v56 = vpop.f32.mrf.mxu2  ;;  %v2557_v57 = vpop.f32.mrf.mxu3 }
 0x2c3   : > { %v2563_v27 = vadd.f32 %v2544_v56, %v2477_v22  ;;  %v2564_v29 = vadd.f32 %v2557_v57, %v2478_v26 }
 0x2c4   : > { %v2617_v58 = vpop.f32.mrf.mxu1 }
 0x2c5   : > { %v2648_v13 = vadd.f32 %v2617_v58, %v2562_v7 }
 0x2c7   : > { %v2604_v60 = vpop.f32.mrf.mxu0 }
 0x2c8   : > { %v2647_v14 = vadd.f32 %v2604_v60, %v2561_v10 }
 0x2ca   : > { %v2546_v59 = vpop.f32.mrf.mxu2  ;;  %v2559_v36 = vpop.f32.mrf.mxu3 }
 0x2cc   : > { %v2619_v61 = vpop.f32.mrf.mxu1 }
 0x2cf   : > { %v2606_v63 = vpop.f32.mrf.mxu0 }
 0x2d2   : > { %v2630_v1 = vpop.f32.mrf.mxu2  ;;  %v2643_v5 = vpop.f32.mrf.mxu3 }
 0x2d3   : > { %v2649_v9 = vadd.f32 %v2630_v1, %v2563_v27  ;;  %v2650_v32 = vadd.f32 %v2643_v5, %v2564_v29 }
 0x2d4   : > { %v2703_v6 = vpop.f32.mrf.mxu1 }
 0x2d5   : > { %v4275_v15 = vadd.f32 %v2703_v6, %v2648_v13 }
 0x2d7   : > { %v2690_v17 = vpop.f32.mrf.mxu0  ;;  %v2748_v24 = vmul.f32 %v4264_v31, %v4275_v15 }
 0x2d8   : > { %v4278_v20 = vadd.f32 %v2690_v17, %v2647_v14 }
 0x2da   : > { %v2632_v16 = vpop.f32.mrf.mxu2  ;;  %v2645_v11 = vpop.f32.mrf.mxu3  ;;  %v2747_v25 = vmul.f32 %v4262_v30, %v4278_v20 }
 0x2dc   : > { %v2705_v21 = vpop.f32.mrf.mxu1  ;;  %v2751_v28 = vpack.c.bf16 %v2748_v24, %v2747_v25  ;;  %v2765_v38 = vadd.f32 %v2748_v24, %v2747_v25 }
 0x2dd   : > { %v2764_v8 = vpop.xlane.xlu1 %2763 }
 0x2de   : > { %2753 = vst [vmem:[%s4287_s16] sm:$0xff] %v2751_v28  ;;  %v2770_v46 = vmax.f32 %v2764_v8, 1.0 }
 0x2df   : > { %v2692_v23 = vpop.f32.mrf.mxu0 }
 0x2e0   : > { %v2771_v47 = vperm.slane %v2770_v46, 0 }
 0x2e2   : > { %v2716_v33 = vpop.f32.mrf.mxu2  ;;  %v2729_v35 = vpop.f32.mrf.mxu3  ;;  %3279 = vrcp.f32 %v2771_v47  ;;  %vm2777_vm2 = vweird.f32 %v2771_v47  ;;  %v2783_v52 = vand.u32 2147483648, %v2771_v47  ;;  %v2781_v54 = vand.u32 2147483647, %v2771_v47 }
 0x2e3   : > { %v2735_v2 = vadd.f32 %v2716_v33, %v2649_v9  ;;  %v2736_v37 = vadd.f32 %v2729_v35, %v2650_v32 }
 0x2e4   : > { %v2784_v55 = vor.u32 1.1754944e-38, %v2783_v52  ;;  %vm2782_vm15 = vcmp.eq.f32.partialorder %v2781_v54, 8.507059e+37 }
 0x2e5   : > { %v2749_v39 = vmul.f32 %v4266_v34, %v2735_v2  ;;  %v2750_v40 = vmul.f32 %v4270_v0, %v2736_v37 }
 0x2e7   : > { %v2766_v41 = vadd.f32 %v2765_v38, %v2749_v39  ;;  %v2752_v42 = vpack.c.bf16 %v2750_v40, %v2749_v39 }
 0x2e8   : > { %v3280_v48 = vpop.eup %3279 }
 0x2e9   : > { %v2767_v43 = vadd.f32 %v2766_v41, %v2750_v40  ;;  %2754 = vst [vmem:[%s4287_s16 + $0x8] sm:$0xff] %v2752_v42  ;;  %v2773_v49 = vmul.f32 %v3280_v48, %v2771_v47  ;;  %vm2778_vm13 = vweird.f32 %v3280_v48 }
 0x2ea   : > { %v2718_v44 = vpop.f32.mrf.mxu2  ;;  %v2731_v45 = vpop.f32.mrf.mxu3  ;;  %vm2779_vm14 = vmor %vm2777_vm2, %vm2778_vm13 }
 0x2eb   : > { %2768 = vadd.xlane.f32.xlu2 %v2767_v43  ;;  %v2774_v50 = vsub.f32 1.0, %v2773_v49 }
 0x2ed   : > { %v2775_v51 = vmul.f32 %v3280_v48, %v2774_v50 }
 0x2ef   : > { %v2776_v53 = vadd.f32 %v3280_v48, %v2775_v51 }
 0x2f1   : > { %v2780_v56 = vsel %vm2779_vm14, %v3280_v48, %v2776_v53 }
 0x2f2   : > { %v2785_v57 = vsel %vm2782_vm15, %v2784_v55, %v2780_v56 }
 0x35e   : > { %v2769_v58 = vpop.xlane.xlu2 %2768 }
 0x35f   : > { %v2786_v59 = vmul.f32 %v2785_v57, %v2769_v58  ;;  %2805 = vst.msk [vmem:[%s379_s24] sm:$0xff] %vm2804_vm0, %v2769_v58 }
 0x361   : > { %v2787_v60 = vsub.f32 %v4278_v20, %v2786_v59  ;;  %v2788_v36 = vsub.f32 %v4275_v15, %v2786_v59  ;;  %v2789_v61 = vsub.f32 %v2735_v2, %v2786_v59  ;;  %v2790_v62 = vsub.f32 %v2736_v37, %v2786_v59 }
 0x363   : > { %v2791_v63 = vmul.f32 %v2787_v60, %v2787_v60  ;;  %v2792_v1 = vmul.f32 %v2788_v36, %v2788_v36  ;;  %v2793_v3 = vmul.f32 %v2789_v61, %v2789_v61 }
 0x364   : > { %3338 = shalt.err (!%p3335_p6)
}
 0x365   : > { %3153 = dma.vmem_to_hbm [thread:$0]  (%p3585_p12), %s2836_s13, 256, %s2838_s14, %s2808_s28   ;;  %v2794_v4 = vmul.f32 %v2790_v62, %v2790_v62  ;;  %v2795_v5 = vmul.f32 %v2791_v63, %v4262_v30  ;;  %v2796_v6 = vmul.f32 %v2792_v1, %v4264_v31  ;;  %v2797_v12 = vmul.f32 %v2793_v3, %v4266_v34 }
 0x366   : > { %s4396_s8 = sld [smem:[#allocation15_spill]] }
 0x367   : > { %v2799_v7 = vadd.f32 %v2796_v6, %v2795_v5  ;;  %v2798_v10 = vmul.f32 %v2794_v4, %v4270_v0 }
 0x369   : > { %v2800_v13 = vadd.f32 %v2799_v7, %v2797_v12 }
 0x36b   : > { %v2801_v14 = vadd.f32 %v2800_v13, %v2798_v10 }
 0x36c   : > { %s387_s6 = scalar_lea.vmem %s4396_s8, %s3033_s19 }
 0x36d   : > { %2802 = vadd.xlane.f32.xlu0 %v2801_v14 }
 0x3e0   : > { %v2803_v15 = vpop.xlane.xlu0 %2802 }
 0x3e1   : > { %2806 = vst.msk [vmem:[%s387_s6] sm:$0xff] %vm2804_vm0, %v2803_v15 }
 0x3e2 PF: > { %p3164_p12 = scmp.ge.s32.totalorder %s3433_s7, 2  ;;  %s2859_s18 = sand.u32 1, %s3393_s21  }
 0x3e3   : > { %s2860_s23 = scalar_lea.sflag [#allocation4], %s2859_s18 }
 0x3e4   : > { %p3160_p8 = pnand %p3164_p12, %p3595_p2 }
 0x3e6   : > { %p3161_p3 = pneg %p3160_p8 }
 0x3e8   : > { %3388 = dma.done.wait (%p3161_p3), %s2860_s23, 256  }
 0x3e9   : > { %3390 = vsyncadd (%p3161_p3), %s2860_s23, 4294967040  ;;  %s23_s7 = sadd.s32 1, %s3433_s7   ;;  %s4398_s9 = sld [smem:[#allocation8_spill]] }
 0x3ea   : > { %p20_p9 = scmp.ge.s32.totalorder %s23_s7, 6   ;;  %s4399_s23 = sld [smem:[#allocation13_spill]] }
 0x3eb   : > { %s4400_s19 = sld [smem:[#allocation9_spill]]  ;;  %s4404_s21 = smov %s3397_s22 }
 0x3ec   : > { %s4401_s26 = sld [smem:[#allocation12_spill]]  ;;  %s4406_s24 = smov %s3409_s25 }
 0x3ed   : > { %s4402_s13 = sld [smem:[#allocation10_spill]]  ;;  %s4408_s27 = smov %s3425_s29 }
 0x3ee   : > { %s4403_s14 = sld [smem:[#allocation11_spill]]  ;;  %s4409_s28 = smov %s3429_s30 }
 0x3ef   : > { %s4405_s22 = smov %s4398_s9 }
 0x3f0   :  { %22 = sbr.rel (!%p20_p9) target bundleno = 11 (0xb), region = 111 }
 0x3f1   : > { %s4407_s25 = smov %s4400_s19 }
 0x3f3   : > { %s4410_s29 = smov %s4402_s13 }
 0x3f4   : > { %s4411_s30 = smov %s4403_s14 }
 0x3f5   :  { %2884 = vsyncpa [#allocation3], 1 }
 0x3f6   :  { %2886 = vsyncpa [#allocation3 + $0x1], 1 }
 0x3f7   :  { %2887 = vsyncpa [#allocation4], 1 }
 0x3f8   :  { %2889 = vsyncpa [#allocation4 + $0x1], 1 }

</bundles_post_ra>
